<compile_context>
chip_gen: v7x
topology: tpu7x:2x2x1
jax: 0.10.0
libtpu: 0.0.40
codegen_flags: <defaults>
</compile_context>

<pallas_src>
import numpy as np
import jax
import jax.numpy as jnp
from jax.experimental import pallas as pl
from jax.experimental.pallas import tpu as pltpu

K_SIZE = 4
STRIDE = 2
PAD = 1
EPS = 1e-5
NEG_SLOPE = 0.2

# parity (o % 2) -> the two (input shift, kernel tap) pairs that contribute along that axis.
#   oh = 2*a + po ; a contribution requires ih = a + dh with the kh listed below (same for width).
_SHIFT_TAPS = {
    0: ((0, 1), (-1, 3)),   # oh even: kh in {1, 3}
    1: ((1, 0), (0, 2)),    # oh odd : kh in {0, 2}
}

# <= half of v7x's 64 MiB physical VMEM, comfortably inside v5e/v6e's 128 MiB.
VMEM_LIMIT_BYTES = 32 * 1024 * 1024


# --------------------------------------------------------------------------------------
# kernels
# --------------------------------------------------------------------------------------
def _matmul_stats_kernel(xg_ref, w_ref, y_ref, psum_ref, psq_ref):
    """One (parity, row-block) tile: conv-as-matmul + per-block channel sum / sum-of-squares."""
    y = jnp.dot(xg_ref[0], w_ref[0], preferred_element_type=jnp.float32)
    y_ref[...] = y[None].astype(y_ref.dtype)                       # bf16 writeback
    psum_ref[...] = jnp.sum(y, axis=0, keepdims=True)[None]        # f32 partial stats
    psq_ref[...] = jnp.sum(y * y, axis=0, keepdims=True)[None]


def _bn_lrelu_kernel(y_ref, scale_ref, shift_ref, o_ref):
    """Streaming y*scale + shift followed by LeakyReLU(0.2); writes back in place."""
    z = y_ref[...].astype(jnp.float32) * scale_ref[...] + shift_ref[...]
    o_ref[...] = jnp.where(z >= 0.0, z, NEG_SLOPE * z).astype(o_ref.dtype)


# --------------------------------------------------------------------------------------
# host-side helpers (static-shape glue)
# --------------------------------------------------------------------------------------
def _round_up(x, m):
    return ((x + m - 1) // m) * m


def _pick_tm(m_par, kc, cout_pad, budget_bytes=12 * 1024 * 1024):
    """Largest row tile whose double-buffered bf16 tiles fit a conservative VMEM budget."""
    kc_eff = _round_up(kc, 128)          # account for lane padding of narrow K tiles
    tm = 128
    for cand in (2048, 1024, 512, 256, 128):
        need = (2 * cand * kc_eff * 2            # xg tile, double buffered, bf16
                + 2 * kc_eff * cout_pad * 2      # weight tile (small, constant index)
                + 2 * cand * cout_pad * 2        # y output tile, bf16
                + 4 * cout_pad * 4)              # partial-stat tiles, f32
        if need <= budget_bytes:
            tm = cand
            break
    return min(tm, _round_up(m_par, 128))


def _pick_bn_tile(m_pad, cout_pad, budget_bytes=8 * 1024 * 1024):
    """Big lane-dense blocks for the mem-bound elementwise pass (per-step overhead ~0.35us)."""
    for cand in (4096, 2048, 1024, 512, 256, 128):
        if m_pad % cand == 0 and 8 * cand * cout_pad <= budget_bytes:
            return cand
    return 128


def _build_parity_inputs(x_nhwc, weight, cout_pad):
    """Per-parity patch matrices (bf16) and matching weight matrices (bf16, Cout zero-padded)."""
    N, H, W, Cin = x_nhwc.shape
    Cout = weight.shape[1]
    xp = jnp.pad(x_nhwc, ((0, 0), (1, 1), (1, 1), (0, 0)))         # zero ring = OOB taps
    xg_list, w_list = [], []
    for po in (0, 1):
        for pw in (0, 1):
            taps_x, taps_w = [], []
            for dh, kh in _SHIFT_TAPS[po]:
                for dw, kw in _SHIFT_TAPS[pw]:
                    taps_x.append(xp[:, 1 + dh:1 + dh + H, 1 + dw:1 + dw + W, :])
                    taps_w.append(weight[:, :, kh, kw])            # (Cin, Cout)
            xg_list.append(jnp.concatenate(taps_x, axis=-1).reshape(N * H * W, 4 * Cin))
            w_list.append(jnp.concatenate(taps_w, axis=0))         # (4*Cin, Cout)
    xg = jnp.stack(xg_list, axis=0)                                # (4, N*H*W, 4*Cin)
    wm = jnp.stack(w_list, axis=0)                                 # (4, 4*Cin, Cout)
    wm = jnp.pad(wm, ((0, 0), (0, 0), (0, cout_pad - Cout)))
    return xg.astype(jnp.bfloat16), wm.astype(jnp.bfloat16)


# --------------------------------------------------------------------------------------
# forward
# --------------------------------------------------------------------------------------
def basic_upsample_block(x, weight, gamma, beta):
    """x: (N, Cin, H, W) NCHW, weight: (Cin, Cout, 4, 4), gamma/beta: (Cout,)."""
    N, Cin, H, W = x.shape
    Cout = weight.shape[1]
    OH, OW = STRIDE * H, STRIDE * W
    cout_pad = max(128, _round_up(Cout, 128))
    kc = 4 * Cin

    x_nhwc = jnp.transpose(x, (0, 2, 3, 1))
    xg, wm = _build_parity_inputs(x_nhwc, weight, cout_pad)

    m_par = N * H * W
    tm = _pick_tm(m_par, kc, cout_pad)
    m_pad = _round_up(m_par, tm)
    n_mb = m_pad // tm
    if m_pad != m_par:
        # zero rows contribute 0 to sum / sum-of-squares -> stats stay exact
        xg = jnp.pad(xg, ((0, 0), (0, m_pad - m_par), (0, 0)))

    # ---- kernel A: 4 parity matmuls + per-block partial batch stats ------------------
    y, psum, psq = pl.pallas_call(
        _matmul_stats_kernel,
        out_shape=(
            jax.ShapeDtypeStruct((4, m_pad, cout_pad), jnp.bfloat16),
            jax.ShapeDtypeStruct((4 * n_mb, 1, cout_pad), jnp.float32),
            jax.ShapeDtypeStruct((4 * n_mb, 1, cout_pad), jnp.float32),
        ),
        grid_spec=pltpu.PrefetchScalarGridSpec(
            num_scalar_prefetch=0,
            grid=(4, n_mb),
            in_specs=[
                pl.BlockSpec((1, tm, kc), lambda p, i: (p, i, 0)),
                pl.BlockSpec((1, kc, cout_pad), lambda p, i: (p, 0, 0)),
            ],
            out_specs=[
                pl.BlockSpec((1, tm, cout_pad), lambda p, i: (p, i, 0)),
                pl.BlockSpec((1, 1, cout_pad), lambda p, i: (p * n_mb + i, 0, 0)),
                pl.BlockSpec((1, 1, cout_pad), lambda p, i: (p * n_mb + i, 0, 0)),
            ],
        ),
        compiler_params=pltpu.CompilerParams(
            dimension_semantics=("parallel", "parallel"),
            vmem_limit_bytes=VMEM_LIMIT_BYTES,
        ),
    )(xg, wm)

    # ---- tiny XLA glue: reduce partials, fold BN into (scale, shift) -----------------
    m_total = float(N * OH * OW)
    mean = jnp.sum(psum, axis=0) / m_total                         # (1, cout_pad)
    var = jnp.maximum(jnp.sum(psq, axis=0) / m_total - mean * mean, 0.0)  # biased (train BN)
    inv = jax.lax.rsqrt(var + EPS)
    gamma_p = jnp.pad(gamma.astype(jnp.float32), (0, cout_pad - Cout)).reshape(1, cout_pad)
    beta_p = jnp.pad(beta.astype(jnp.float32), (0, cout_pad - Cout)).reshape(1, cout_pad)
    scale = (gamma_p * inv).reshape(1, 1, cout_pad)
    shift = (beta_p - mean * gamma_p * inv).reshape(1, 1, cout_pad)

    # ---- kernel B: streaming normalize + LeakyReLU, in place over y ------------------
    tbn = _pick_bn_tile(m_pad, cout_pad)
    out = pl.pallas_call(
        _bn_lrelu_kernel,
        out_shape=jax.ShapeDtypeStruct((4, m_pad, cout_pad), jnp.bfloat16),
        grid_spec=pltpu.PrefetchScalarGridSpec(
            num_scalar_prefetch=0,
            grid=(4, m_pad // tbn),
            in_specs=[
                pl.BlockSpec((1, tbn, cout_pad), lambda p, i: (p, i, 0)),
                pl.BlockSpec((1, 1, cout_pad), lambda p, i: (0, 0, 0)),
                pl.BlockSpec((1, 1, cout_pad), lambda p, i: (0, 0, 0)),
            ],
            out_specs=pl.BlockSpec((1, tbn, cout_pad), lambda p, i: (p, i, 0)),
        ),
        compiler_params=pltpu.CompilerParams(
            dimension_semantics=("parallel", "parallel"),
            vmem_limit_bytes=VMEM_LIMIT_BYTES,
        ),
        input_output_aliases={0: 0},     # normalized output overwrites y
    )(y, scale, shift)

    # ---- interleave parity classes back into (N, Cout, OH, OW) -----------------------
    out = out[:, :m_par, :Cout]                                    # (4, N*H*W, Cout)
    out = out.reshape(2, 2, N, H, W, Cout)                         # (po, pw, n, a, b, c)
    out = jnp.transpose(out, (2, 3, 0, 4, 1, 5)).reshape(N, OH, OW, Cout)
    return jnp.transpose(out, (0, 3, 1, 2)).astype(jnp.float32)    # NCHW


# --------------------------------------------------------------------------------------
# reference (PyTorch semantics, training-mode BatchNorm) + test
# --------------------------------------------------------------------------------------
def _ref_forward(x, weight, gamma, beta):
    x = np.asarray(x, np.float64)
    weight = np.asarray(weight, np.float64)
    N, Cin, H, W = x.shape
    Cout = weight.shape[1]
    K, s, p = K_SIZE, STRIDE, PAD
    OH = (H - 1) * s - 2 * p + K
    OW = (W - 1) * s - 2 * p + K
    y = np.zeros((N, Cout, OH, OW))
    for ih in range(H):
        for iw in range(W):
            for kh in range(K):
                for kw in range(K):
                    ohh = ih * s - p + kh
                    oww = iw * s - p + kw
                    if 0 <= ohh < OH and 0 <= oww < OW:
                        y[:, :, ohh, oww] += np.einsum(
                            'ni,io->no', x[:, :, ih, iw], weight[:, :, kh, kw])
    mean = y.mean(axis=(0, 2, 3), keepdims=True)
    var = y.var(axis=(0, 2, 3), keepdims=True)
    g = np.asarray(gamma, np.float64).reshape(1, Cout, 1, 1)
    b = np.asarray(beta, np.float64).reshape(1, Cout, 1, 1)
    yn = (y - mean) / np.sqrt(var + EPS) * g + b
    return np.where(yn >= 0, yn, NEG_SLOPE * yn)


if __name__ == "__main__":
    key = jax.random.PRNGKey(0)
    k1, k2 = jax.random.split(key)

    N, Cin, Cout, H, W = 2, 4, 8, 16, 16
    x = jax.random.normal(k1, (N, Cin, H, W), jnp.float32)
    fan = Cin * K_SIZE * K_SIZE
    # ConvTranspose2d weight shape: (in_channel, out_channel, K, K), bias=False
    weight = jax.random.normal(k2, (Cin, Cout, K_SIZE, K_SIZE), jnp.float32) / np.sqrt(fan)
    # BatchNorm2d default init: gamma=1, beta=0
    gamma = jnp.ones((Cout,), jnp.float32)
    beta = jnp.zeros((Cout,), jnp.float32)
    # TODO(synk): BatchNorm running-stat updates (a training side effect) are not modeled;
    # they do not affect the returned forward output.

    out = jax.jit(basic_upsample_block)(x, weight, gamma, beta)
    out = jax.block_until_ready(out)

    # reference computed from bf16-rounded inputs (the kernel feeds the MXU in bf16)
    x_q = np.asarray(x.astype(jnp.bfloat16).astype(jnp.float32))
    w_q = np.asarray(weight.astype(jnp.bfloat16).astype(jnp.float32))
    ref = _ref_forward(x_q, w_q, gamma, beta)
    np.testing.assert_allclose(np.asarray(out), ref, rtol=1e-2, atol=1e-2)
    print("KERNEL_OK")
</pallas_src>

<mosaic_0001>
module attributes {stable_mosaic.version = 11 : i64} {
  func.func @_matmul_stats_kernel(%arg0: i32, %arg1: i32, %arg2: memref<1x512x16xbf16, #tpu.memory_space<vmem>>, %arg3: memref<1x16x128xbf16, #tpu.memory_space<vmem>>, %arg4: memref<1x512x128xbf16, #tpu.memory_space<vmem>>, %arg5: memref<1x1x128xf32, #tpu.memory_space<vmem>>, %arg6: memref<1x1x128xf32, #tpu.memory_space<vmem>>) attributes {dimension_semantics = [#tpu.dimension_semantics<parallel>, #tpu.dimension_semantics<parallel>], iteration_bounds = array<i64: 4, 1>, scalar_prefetch = 0 : i64, scratch_operands = 0 : i64, tpu.core_type = #tpu.core_type<tc>, window_params = [{transform_indices = @transform_0, window_bounds = array<i64: 1, 512, 16>}, {transform_indices = @transform_1, window_bounds = array<i64: 1, 16, 128>}, {transform_indices = @transform_2, window_bounds = array<i64: 1, 512, 128>}, {transform_indices = @transform_3, window_bounds = array<i64: 1, 1, 128>}, {transform_indices = @transform_4, window_bounds = array<i64: 1, 1, 128>}]} {
    %c0 = arith.constant 0 : index
    %c0_0 = arith.constant 0 : index
    %c0_1 = arith.constant 0 : index
    %0 = vector.load %arg2[%c0, %c0_0, %c0_1] : memref<1x512x16xbf16, #tpu.memory_space<vmem>>, vector<1x512x16xbf16>
    %1 = vector.shape_cast %0 : vector<1x512x16xbf16> to vector<512x16xbf16>
    %c0_2 = arith.constant 0 : index
    %c0_3 = arith.constant 0 : index
    %c0_4 = arith.constant 0 : index
    %2 = vector.load %arg3[%c0_2, %c0_3, %c0_4] : memref<1x16x128xbf16, #tpu.memory_space<vmem>>, vector<1x16x128xbf16>
    %3 = vector.shape_cast %2 : vector<1x16x128xbf16> to vector<16x128xbf16>
    %cst = arith.constant dense<0.000000e+00> : vector<512x128xf32>
    %4 = tpu.matmul %1, %3, %cst {dimension_numbers = #tpu.dot_dimension_numbers<[1], [0], [0], [1], [0, 0, 1, 1], [], []>} : vector<512x16xbf16>, vector<16x128xbf16>, vector<512x128xf32> -> vector<512x128xf32>
    %5 = vector.shape_cast %4 : vector<512x128xf32> to vector<1x512x128xf32>
    %6 = arith.truncf %5 : vector<1x512x128xf32> to vector<1x512x128xbf16>
    %c0_5 = arith.constant 0 : index
    %c0_6 = arith.constant 0 : index
    %c0_7 = arith.constant 0 : index
    %7 = vector.load %arg4[%c0_5, %c0_6, %c0_7] : memref<1x512x128xbf16, #tpu.memory_space<vmem>>, vector<1x512x128xbf16>
    tpu.vector_store %arg4[%c0_5, %c0_6, %c0_7], %6 {strides = array<i32>} : memref<1x512x128xbf16, #tpu.memory_space<vmem>>, vector<1x512x128xbf16>,
    %cst_8 = arith.constant dense<0.000000e+00> : vector<128xf32>
    %8 = vector.multi_reduction <add>, %4, %cst_8 [0] : vector<512x128xf32> to vector<128xf32>
    %9 = vector.shape_cast %8 : vector<128xf32> to vector<1x128xf32>
    %10 = vector.shape_cast %9 : vector<1x128xf32> to vector<1x1x128xf32>
    %c0_9 = arith.constant 0 : index
    %c0_10 = arith.constant 0 : index
    %c0_11 = arith.constant 0 : index
    %11 = vector.load %arg5[%c0_9, %c0_10, %c0_11] : memref<1x1x128xf32, #tpu.memory_space<vmem>>, vector<1x1x128xf32>
    tpu.vector_store %arg5[%c0_9, %c0_10, %c0_11], %10 {strides = array<i32>} : memref<1x1x128xf32, #tpu.memory_space<vmem>>, vector<1x1x128xf32>,
    %12 = arith.mulf %4, %4 : vector<512x128xf32>
    %cst_12 = arith.constant dense<0.000000e+00> : vector<128xf32>
    %13 = vector.multi_reduction <add>, %12, %cst_12 [0] : vector<512x128xf32> to vector<128xf32>
    %14 = vector.shape_cast %13 : vector<128xf32> to vector<1x128xf32>
    %15 = vector.shape_cast %14 : vector<1x128xf32> to vector<1x1x128xf32>
    %c0_13 = arith.constant 0 : index
    %c0_14 = arith.constant 0 : index
    %c0_15 = arith.constant 0 : index
    %16 = vector.load %arg6[%c0_13, %c0_14, %c0_15] : memref<1x1x128xf32, #tpu.memory_space<vmem>>, vector<1x1x128xf32>
    tpu.vector_store %arg6[%c0_13, %c0_14, %c0_15], %15 {strides = array<i32>} : memref<1x1x128xf32, #tpu.memory_space<vmem>>, vector<1x1x128xf32>,
    return
  }
  func.func @transform_0(%arg0: i32, %arg1: i32) -> (i32, i32, i32) {
    %c0_i32 = arith.constant 0 : i32
    %c0_i32_0 = arith.constant 0 : i32
    return %arg0, %arg1, %c0_i32 : i32, i32, i32
  }
  func.func @transform_1(%arg0: i32, %arg1: i32) -> (i32, i32, i32) {
    %c0_i32 = arith.constant 0 : i32
    %c0_i32_0 = arith.constant 0 : i32
    %c0_i32_1 = arith.constant 0 : i32
    return %arg0, %c0_i32, %c0_i32_0 : i32, i32, i32
  }
  func.func @transform_2(%arg0: i32, %arg1: i32) -> (i32, i32, i32) {
    %c0_i32 = arith.constant 0 : i32
    %c0_i32_0 = arith.constant 0 : i32
    return %arg0, %arg1, %c0_i32 : i32, i32, i32
  }
  func.func @transform_3(%arg0: i32, %arg1: i32) -> (i32, i32, i32) {
    %c1_i32 = arith.constant 1 : i32
    %0 = arith.muli %arg0, %c1_i32 : i32
    %1 = arith.addi %0, %arg1 : i32
    %c0_i32 = arith.constant 0 : i32
    %c0_i32_0 = arith.constant 0 : i32
    %c0_i32_1 = arith.constant 0 : i32
    return %1, %c0_i32, %c0_i32_0 : i32, i32, i32
  }
  func.func @transform_4(%arg0: i32, %arg1: i32) -> (i32, i32, i32) {
    %c1_i32 = arith.constant 1 : i32
    %0 = arith.muli %arg0, %c1_i32 : i32
    %1 = arith.addi %0, %arg1 : i32
    %c0_i32 = arith.constant 0 : i32
    %c0_i32_0 = arith.constant 0 : i32
    %c0_i32_1 = arith.constant 0 : i32
    return %1, %c0_i32, %c0_i32_0 : i32, i32, i32
  }
}

module attributes {stable_mosaic.version = 11 : i64} {
  func.func @_bn_lrelu_kernel(%arg0: i32, %arg1: i32, %arg2: memref<1x512x128xbf16, #tpu.memory_space<vmem>>, %arg3: memref<1x1x128xf32, #tpu.memory_space<vmem>>, %arg4: memref<1x1x128xf32, #tpu.memory_space<vmem>>, %arg5: memref<1x512x128xbf16, #tpu.memory_space<vmem>>) attributes {dimension_semantics = [#tpu.dimension_semantics<parallel>, #tpu.dimension_semantics<parallel>], iteration_bounds = array<i64: 4, 1>, scalar_prefetch = 0 : i64, scratch_operands = 0 : i64, tpu.core_type = #tpu.core_type<tc>, window_params = [{transform_indices = @transform_0, window_bounds = array<i64: 1, 512, 128>}, {pipeline_mode = #tpu.pipeline_mode<synchronous>, transform_indices = @transform_1, window_bounds = array<i64: 1, 1, 128>}, {pipeline_mode = #tpu.pipeline_mode<synchronous>, transform_indices = @transform_2, window_bounds = array<i64: 1, 1, 128>}, {transform_indices = @transform_3, window_bounds = array<i64: 1, 512, 128>}]} {
    %c0 = arith.constant 0 : index
    %c0_0 = arith.constant 0 : index
    %c0_1 = arith.constant 0 : index
    %0 = vector.load %arg2[%c0, %c0_0, %c0_1] : memref<1x512x128xbf16, #tpu.memory_space<vmem>>, vector<1x512x128xbf16>
    %1 = arith.extf %0 : vector<1x512x128xbf16> to vector<1x512x128xf32>
    %c0_2 = arith.constant 0 : index
    %c0_3 = arith.constant 0 : index
    %c0_4 = arith.constant 0 : index
    %2 = vector.load %arg3[%c0_2, %c0_3, %c0_4] : memref<1x1x128xf32, #tpu.memory_space<vmem>>, vector<1x1x128xf32>
    %3 = vector.broadcast %2 : vector<1x1x128xf32> to vector<1x512x128xf32>
    %4 = arith.mulf %1, %3 : vector<1x512x128xf32>
    %c0_5 = arith.constant 0 : index
    %c0_6 = arith.constant 0 : index
    %c0_7 = arith.constant 0 : index
    %5 = vector.load %arg4[%c0_5, %c0_6, %c0_7] : memref<1x1x128xf32, #tpu.memory_space<vmem>>, vector<1x1x128xf32>
    %6 = vector.broadcast %5 : vector<1x1x128xf32> to vector<1x512x128xf32>
    %7 = arith.addf %4, %6 : vector<1x512x128xf32>
    %cst = arith.constant 0.000000e+00 : f32
    %8 = vector.broadcast %cst : f32 to vector<1x512x128xf32>
    %9 = arith.cmpf oge, %7, %8 : vector<1x512x128xf32>
    %cst_8 = arith.constant 2.000000e-01 : f32
    %10 = vector.broadcast %cst_8 : f32 to vector<1x512x128xf32>
    %11 = arith.mulf %10, %7 : vector<1x512x128xf32>
    %12 = arith.select %9, %7, %11 : vector<1x512x128xi1>, vector<1x512x128xf32>
    %13 = arith.truncf %12 : vector<1x512x128xf32> to vector<1x512x128xbf16>
    %c0_9 = arith.constant 0 : index
    %c0_10 = arith.constant 0 : index
    %c0_11 = arith.constant 0 : index
    %14 = vector.load %arg5[%c0_9, %c0_10, %c0_11] : memref<1x512x128xbf16, #tpu.memory_space<vmem>>, vector<1x512x128xbf16>
    tpu.vector_store %arg5[%c0_9, %c0_10, %c0_11], %13 {strides = array<i32>} : memref<1x512x128xbf16, #tpu.memory_space<vmem>>, vector<1x512x128xbf16>,
    return
  }
  func.func @transform_0(%arg0: i32, %arg1: i32) -> (i32, i32, i32) {
    %c0_i32 = arith.constant 0 : i32
    %c0_i32_0 = arith.constant 0 : i32
    return %arg0, %arg1, %c0_i32 : i32, i32, i32
  }
  func.func @transform_1(%arg0: i32, %arg1: i32) -> (i32, i32, i32) {
    %c0_i32 = arith.constant 0 : i32
    %c0_i32_0 = arith.constant 0 : i32
    %c0_i32_1 = arith.constant 0 : i32
    %c0_i32_2 = arith.constant 0 : i32
    return %c0_i32, %c0_i32_0, %c0_i32_1 : i32, i32, i32
  }
  func.func @transform_2(%arg0: i32, %arg1: i32) -> (i32, i32, i32) {
    %c0_i32 = arith.constant 0 : i32
    %c0_i32_0 = arith.constant 0 : i32
    %c0_i32_1 = arith.constant 0 : i32
    %c0_i32_2 = arith.constant 0 : i32
    return %c0_i32, %c0_i32_0, %c0_i32_1 : i32, i32, i32
  }
  func.func @transform_3(%arg0: i32, %arg1: i32) -> (i32, i32, i32) {
    %c0_i32 = arith.constant 0 : i32
    %c0_i32_0 = arith.constant 0 : i32
    return %arg0, %arg1, %c0_i32 : i32, i32, i32
  }
}

</mosaic_0001>

<bundles_post_ra>
// kernel: basic_upsample_block.2
= control target key start
LH: loop header
LB: loop body
LE: loop exit
PB: predicated region body
PF: predicated region fallthrough
CT: control target
= control target key end

     0   :  { %s2189_s15 = smov 0   ;;  %s2191_s16 = smov 0   ;;  %s2533_s0 = inlined_call_operand.vmem [shape: bf16[4,512,16], index: 0, kind: input, shape index: {}]   ;;  %s2534_s1 = inlined_call_operand.vmem [shape: bf16[4,16,128], index: 1, kind: input, shape index: {}]   ;;  %s2535_s2 = inlined_call_operand.vmem [shape: bf16[4,512,128], index: 2, kind: output, shape index: {0}]   ;;  %s2536_s3 = inlined_call_operand.vmem [shape: f32[4,1,128], index: 3, kind: output, shape index: {1}]   ;;  %s2537_s4 = inlined_call_operand.vmem [shape: f32[4,1,128], index: 4, kind: output, shape index: {2}]  }
   0x1   :  { %s2193_s17 = smov 0  }
   0x2 LB: > { %s27_s18 = sadd.s32 1, %s2158_s16  ;;  %p1586_p0 = scmp.ge.s32.totalorder %s2162_s17, 1  ;;  %s2162_s17 = sphi %s2193_s17, %s15_s17   ;;  %s2158_s16 = sphi %s2191_s16, %s2539_s16   ;;  %s2154_s15 = sphi %s2189_s15, %s2538_s15  }
   0x3   : > { %p29_p1 = scmp.ge.s32.totalorder %s27_s18, 4  ;;  %p202_p2 = scmp.lt.s32.totalorder %s2162_s17, 5 }
   0x5   : > { %s2541_s18 = smov (%p29_p1, %s27_s18), 0  ;;  %p203_p3 = pnand %p1586_p0, %p202_p2 }
   0x6   : > { %p250_p4 = scmp.lt.s32.totalorder (!%p203_p3), %s2154_s15, 3  ;;  %vm517_vm0 = vcmask (!%p203_p3), 130048  }
   0x7   : > { %206 = sbr.rel (%p203_p3) target bundleno = 378 (0x17a), region = 28 }
   0xe   : > { %s2543_s15 = smov (!%p250_p4, %s2154_s15), 3 }
   0xf   : > { %s1724_s19 = sshll.u32 %s2543_s15, 8  ;;  %s1725_s20 = sshll.u32 %s2543_s15, 3 }
  0x10   : > { %s2216_s23 = scalar_lea.vmem %s2533_s0, %s1724_s19  ;;  %s263_s26 = scalar_lea.vmem %s2534_s1, %s1725_s20 }
  0x11   : > { %v2107_v0 = vld [vmem:[%s263_s26] sm:$0xff]   ;;  %v2109_v2 = vld [vmem:[%s2216_s23 + $0x8] sm:$0xff]   ;;  %v2110_v3 = vld [vmem:[%s2216_s23 + $0x10] sm:$0xff]   ;;  %s2290_s29 = scalar_lea.vmem %s2535_s2, %s1724_s19  ;;  %s277_s6 = scalar_lea.vmem %s2536_s3, %s2543_s15 }
  0x12   : > { %v2108_v1 = vld [vmem:[%s2216_s23] sm:$0xff]   ;;  %2015 = vmatprep.subr.bf16.mxu0 %v2107_v0  ;;  %2081 = vmatprep.subr.bf16.mxu1 %v2107_v0  ;;  %v2111_v4 = vld [vmem:[%s2216_s23 + $0x18] sm:$0xff]   ;;  %v2113_v6 = vld [vmem:[%s2216_s23 + $0x28] sm:$0xff]   ;;  %s282_s9 = scalar_lea.vmem %s2537_s4, %s2543_s15 }
  0x13   : > { %2016 = vmatpush3.bf16.msra.mxu0 %v2107_v0  ;;  %2017 = vmatprep.mubr.msk.bf16.mxu0 %vm517_vm0, %v2108_v1  ;;  %v2112_v5 = vld [vmem:[%s2216_s23 + $0x20] sm:$0xff]   ;;  %v2114_v7 = vld [vmem:[%s2216_s23 + $0x30] sm:$0xff]   ;;  %v2125_v9 = vld [vmem:[%s2216_s23 + $0x88] sm:$0xff]  }
  0x14   : > { %2082 = vmatpush3.bf16.msra.mxu1 %v2107_v0  ;;  %v2124_v8 = vld [vmem:[%s2216_s23 + $0x80] sm:$0xff]   ;;  %v2126_v10 = vld [vmem:[%s2216_s23 + $0x90] sm:$0xff]   ;;  %v2127_v11 = vld [vmem:[%s2216_s23 + $0x98] sm:$0xff]  }
  0x15   : > { %2049 = vmatprep.mubr.msk.bf16.mxu1 %vm517_vm0, %v2124_v8  ;;  %v2128_v12 = vld [vmem:[%s2216_s23 + $0xa0] sm:$0xff]   ;;  %v2115_v13 = vld [vmem:[%s2216_s23 + $0x38] sm:$0xff]   ;;  %v2129_v15 = vld [vmem:[%s2216_s23 + $0xa8] sm:$0xff]  }
  0x16   : > { %2018 = vmatmul.mubr.msk.bf16.vlgmr.msra.gmra.mrb[0].mxu0 %vm517_vm0, %v2109_v2  ;;  %v2116_v14 = vld [vmem:[%s2216_s23 + $0x40] sm:$0xff]   ;;  %v2130_v16 = vld [vmem:[%s2216_s23 + $0xb0] sm:$0xff]   ;;  %v2117_v17 = vld [vmem:[%s2216_s23 + $0x48] sm:$0xff]  }
  0x17   : > { %2021 = vmatprep.mubr.msk.bf16.mxu0 %vm517_vm0, %v2110_v3  ;;  %2050 = vmatmul.mubr.msk.bf16.vlgmr.msra.gmra.mrb[0].mxu1 %vm517_vm0, %v2125_v9  ;;  %v2118_v18 = vld [vmem:[%s2216_s23 + $0x50] sm:$0xff]   ;;  %v2131_v19 = vld [vmem:[%s2216_s23 + $0xb8] sm:$0xff]   ;;  %v2132_v20 = vld [vmem:[%s2216_s23 + $0xc0] sm:$0xff]  }
  0x18   : > { %2053 = vmatprep.mubr.msk.bf16.mxu1 %vm517_vm0, %v2126_v10  ;;  %v2119_v21 = vld [vmem:[%s2216_s23 + $0x58] sm:$0xff]   ;;  %v2120_v22 = vld [vmem:[%s2216_s23 + $0x60] sm:$0xff]   ;;  %v2133_v23 = vld [vmem:[%s2216_s23 + $0xc8] sm:$0xff]  }
  0x19   : > { %v2134_v24 = vld [vmem:[%s2216_s23 + $0xd0] sm:$0xff]   ;;  %v2121_v25 = vld [vmem:[%s2216_s23 + $0x68] sm:$0xff]   ;;  %v2135_v27 = vld [vmem:[%s2216_s23 + $0xd8] sm:$0xff]  }
  0x1a   : > { %v2122_v26 = vld [vmem:[%s2216_s23 + $0x70] sm:$0xff]   ;;  %v2136_v28 = vld [vmem:[%s2216_s23 + $0xe0] sm:$0xff]   ;;  %v2123_v29 = vld [vmem:[%s2216_s23 + $0x78] sm:$0xff]  }
  0x1b   : > { %v2137_v30 = vld [vmem:[%s2216_s23 + $0xe8] sm:$0xff]   ;;  %v2138_v31 = vld [vmem:[%s2216_s23 + $0xf0] sm:$0xff]   ;;  %v2139_v32 = vld [vmem:[%s2216_s23 + $0xf8] sm:$0xff]  }
  0x1e   : > { %2022 = vmatmul.mubr.msk.bf16.gmra.mrb[4].mxu0 %vm517_vm0, %v2111_v4 }
  0x1f   : > { %2025 = vmatprep.mubr.msk.bf16.mxu0 %vm517_vm0, %v2112_v5  ;;  %2054 = vmatmul.mubr.msk.bf16.gmra.mrb[4].mxu1 %vm517_vm0, %v2127_v11 }
  0x20   : > { %2057 = vmatprep.mubr.msk.bf16.mxu1 %vm517_vm0, %v2128_v12 }
  0x26   : > { %2026 = vmatmul.mubr.msk.bf16.gmra.mrb[8].mxu0 %vm517_vm0, %v2113_v6 }
  0x27   : > { %2029 = vmatprep.mubr.msk.bf16.mxu0 %vm517_vm0, %v2114_v7  ;;  %2058 = vmatmul.mubr.msk.bf16.gmra.mrb[8].mxu1 %vm517_vm0, %v2129_v15 }
  0x28   : > { %2061 = vmatprep.mubr.msk.bf16.mxu1 %vm517_vm0, %v2130_v16 }
  0x2e   : > { %2030 = vmatmul.mubr.msk.bf16.gmra.mrb[12].mxu0 %vm517_vm0, %v2115_v13 }
  0x2f   : > { %2033 = vmatprep.mubr.msk.bf16.mxu0 %vm517_vm0, %v2116_v14  ;;  %2062 = vmatmul.mubr.msk.bf16.gmra.mrb[12].mxu1 %vm517_vm0, %v2131_v19 }
  0x30   : > { %2065 = vmatprep.mubr.msk.bf16.mxu1 %vm517_vm0, %v2132_v20 }
  0x36   : > { %2034 = vmatmul.mubr.msk.bf16.gmra.mrb[16].mxu0 %vm517_vm0, %v2117_v17 }
  0x37   : > { %2037 = vmatprep.mubr.msk.bf16.mxu0 %vm517_vm0, %v2118_v18  ;;  %2066 = vmatmul.mubr.msk.bf16.gmra.mrb[16].mxu1 %vm517_vm0, %v2133_v23 }
  0x38   : > { %2069 = vmatprep.mubr.msk.bf16.mxu1 %vm517_vm0, %v2134_v24 }
  0x3e   : > { %2038 = vmatmul.mubr.msk.bf16.gmra.mrb[20].mxu0 %vm517_vm0, %v2119_v21 }
  0x3f   : > { %2041 = vmatprep.mubr.msk.bf16.mxu0 %vm517_vm0, %v2120_v22  ;;  %2070 = vmatmul.mubr.msk.bf16.gmra.mrb[20].mxu1 %vm517_vm0, %v2135_v27 }
  0x40   : > { %2073 = vmatprep.mubr.msk.bf16.mxu1 %vm517_vm0, %v2136_v28 }
  0x46   : > { %2042 = vmatmul.mubr.msk.bf16.gmra.mrb[24].mxu0 %vm517_vm0, %v2121_v25 }
  0x47   : > { %2045 = vmatprep.mubr.msk.bf16.mxu0 %vm517_vm0, %v2122_v26  ;;  %2074 = vmatmul.mubr.msk.bf16.gmra.mrb[24].mxu1 %vm517_vm0, %v2137_v30 }
  0x48   : > { %2077 = vmatprep.mubr.msk.bf16.mxu1 %vm517_vm0, %v2138_v31 }
  0x4e   : > { %2046 = vmatmul.mubr.msk.bf16.gmra.mrb[28].mxu0 %vm517_vm0, %v2123_v29 }
  0x4f   : > { %2078 = vmatmul.mubr.msk.bf16.gmra.mrb[28].mxu1 %vm517_vm0, %v2139_v32 }
  0xe9   : > { %v2019_v33 = vpop.f32.mrb[0].mxu0 }
  0xea   : > { %v648_v34 = vpop.f32.mrb[1].mxu0  ;;  %v1295_v42 = vmul.f32 %v2019_v33, %v2019_v33  ;;  %v2296_v63 = vpop.f32.mrb[0].mxu1 }
  0xeb   : > { %v2020_v35 = vpop.f32.mrb[2].mxu0  ;;  %v1293_v38 = vmul.f32 %v648_v34, %v648_v34  ;;  %v2298_v0 = vpop.f32.mrb[1].mxu1 }
  0xec   : > { %v1799_v36 = vpack.c.bf16 %v2020_v35, %v2019_v33  ;;  %v651_v37 = vpop.f32.mrb[3].mxu0  ;;  %v1296_v45 = vmul.f32 %v2020_v35, %v2020_v35  ;;  %v2300_v5 = vpop.f32.mrb[2].mxu1 }
  0xed   : > { %v1794_v39 = vpack.c.bf16 %v651_v37, %v648_v34  ;;  %v1223_v40 = vadd.f32 %v651_v37, %v648_v34  ;;  %v1294_v41 = vmul.f32 %v651_v37, %v651_v37  ;;  %v1879_v7 = vpack.c.bf16 %v2300_v5, %v2296_v63  ;;  %v2304_v8 = vpop.f32.mrb[3].mxu1 }
  0xee   : > { %1951 = vst [vmem:[%s2290_s29 + $0x8] sm:$0xff] %v1799_v36   ;;  %v1874_v13 = vpack.c.bf16 %v2304_v8, %v2298_v0 }
  0xef   : > { %1795 = vst [vmem:[%s2290_s29] sm:$0xff] %v1794_v39   ;;  %v1224_v43 = vadd.f32 %v2019_v33, %v1223_v40  ;;  %v1357_v44 = vadd.f32 %v1294_v41, %v1293_v38  ;;  %1967 = vst [vmem:[%s2290_s29 + $0x88] sm:$0xff] %v1879_v7  }
  0xf0   : > { %1966 = vst [vmem:[%s2290_s29 + $0x80] sm:$0xff] %v1874_v13  }
  0xf1   : > { %v1358_v46 = vadd.f32 %v1357_v44, %v1295_v42  ;;  %v2023_v47 = vpop.f32.mrb[4].mxu0  ;;  %v1225_v48 = vadd.f32 %v2020_v35, %v1224_v43 }
  0xf2   : > { %v664_v49 = vpop.f32.mrb[5].mxu0  ;;  %v1299_v60 = vmul.f32 %v2023_v47, %v2023_v47  ;;  %v2312_v23 = vpop.f32.mrb[4].mxu1 }
  0xf3   : > { %v1226_v50 = vadd.f32 %v1225_v48, %v664_v49  ;;  %v1297_v51 = vmul.f32 %v664_v49, %v664_v49  ;;  %v1359_v52 = vadd.f32 %v1358_v46, %v1296_v45  ;;  %v2024_v53 = vpop.f32.mrb[6].mxu0  ;;  %v2314_v24 = vpop.f32.mrb[5].mxu1 }
  0xf4   : > { %v1809_v54 = vpack.c.bf16 %v2024_v53, %v2023_v47  ;;  %v667_v55 = vpop.f32.mrb[7].mxu0  ;;  %v1300_v1 = vmul.f32 %v2024_v53, %v2024_v53  ;;  %v2316_v29 = vpop.f32.mrb[6].mxu1 }
  0xf5   : > { %v1360_v56 = vadd.f32 %v1359_v52, %v1297_v51  ;;  %v1804_v57 = vpack.c.bf16 %v667_v55, %v664_v49  ;;  %v1227_v58 = vadd.f32 %v1226_v50, %v667_v55  ;;  %v1298_v59 = vmul.f32 %v667_v55, %v667_v55  ;;  %v2320_v32 = vpop.f32.mrb[7].mxu1 }
  0xf6   : > { %1953 = vst [vmem:[%s2290_s29 + $0x18] sm:$0xff] %v1809_v54   ;;  %v1889_v31 = vpack.c.bf16 %v2316_v29, %v2312_v23  ;;  %v1884_v37 = vpack.c.bf16 %v2320_v32, %v2314_v24 }
  0xf7   : > { %1952 = vst [vmem:[%s2290_s29 + $0x10] sm:$0xff] %v1804_v57   ;;  %v1228_v61 = vadd.f32 %v2023_v47, %v1227_v58  ;;  %v1361_v62 = vadd.f32 %v1360_v56, %v1298_v59 }
  0xf8   : > { %1969 = vst [vmem:[%s2290_s29 + $0x98] sm:$0xff] %v1889_v31   ;;  %1968 = vst [vmem:[%s2290_s29 + $0x90] sm:$0xff] %v1884_v37  }
  0xf9   : > { %v1362_v2 = vadd.f32 %v1361_v62, %v1299_v60  ;;  %v2027_v3 = vpop.f32.mrb[8].mxu0  ;;  %v1229_v4 = vadd.f32 %v2024_v53, %v1228_v61 }
  0xfa   : > { %v680_v6 = vpop.f32.mrb[9].mxu0  ;;  %v1303_v20 = vmul.f32 %v2027_v3, %v2027_v3  ;;  %v2328_v47 = vpop.f32.mrb[8].mxu1 }
  0xfb   : > { %v1230_v9 = vadd.f32 %v1229_v4, %v680_v6  ;;  %v1301_v10 = vmul.f32 %v680_v6, %v680_v6  ;;  %v1363_v11 = vadd.f32 %v1362_v2, %v1300_v1  ;;  %v2028_v12 = vpop.f32.mrb[10].mxu0  ;;  %v2330_v48 = vpop.f32.mrb[9].mxu1 }
  0xfc   : > { %v1819_v14 = vpack.c.bf16 %v2028_v12, %v2027_v3  ;;  %v683_v15 = vpop.f32.mrb[11].mxu0  ;;  %v1304_v25 = vmul.f32 %v2028_v12, %v2028_v12  ;;  %v2332_v53 = vpop.f32.mrb[10].mxu1 }
  0xfd   : > { %v1364_v16 = vadd.f32 %v1363_v11, %v1301_v10  ;;  %v1814_v17 = vpack.c.bf16 %v683_v15, %v680_v6  ;;  %v1231_v18 = vadd.f32 %v1230_v9, %v683_v15  ;;  %v1302_v19 = vmul.f32 %v683_v15, %v683_v15  ;;  %v2336_v56 = vpop.f32.mrb[11].mxu1 }
  0xfe   : > { %1955 = vst [vmem:[%s2290_s29 + $0x28] sm:$0xff] %v1819_v14   ;;  %v1899_v55 = vpack.c.bf16 %v2332_v53, %v2328_v47  ;;  %v1894_v61 = vpack.c.bf16 %v2336_v56, %v2330_v48 }
  0xff   : > { %1954 = vst [vmem:[%s2290_s29 + $0x20] sm:$0xff] %v1814_v17   ;;  %v1232_v21 = vadd.f32 %v2027_v3, %v1231_v18  ;;  %v1365_v22 = vadd.f32 %v1364_v16, %v1302_v19 }
 0x100   : > { %1971 = vst [vmem:[%s2290_s29 + $0xa8] sm:$0xff] %v1899_v55   ;;  %1970 = vst [vmem:[%s2290_s29 + $0xa0] sm:$0xff] %v1894_v61  }
 0x101   : > { %v1366_v26 = vadd.f32 %v1365_v22, %v1303_v20  ;;  %v2031_v27 = vpop.f32.mrb[12].mxu0  ;;  %v1233_v28 = vadd.f32 %v2028_v12, %v1232_v21 }
 0x102   : > { %v696_v30 = vpop.f32.mrb[13].mxu0  ;;  %v1307_v44 = vmul.f32 %v2031_v27, %v2031_v27  ;;  %v2344_v11 = vpop.f32.mrb[12].mxu1 }
 0x103   : > { %v1234_v33 = vadd.f32 %v1233_v28, %v696_v30  ;;  %v1305_v34 = vmul.f32 %v696_v30, %v696_v30  ;;  %v1367_v35 = vadd.f32 %v1366_v26, %v1304_v25  ;;  %v2032_v36 = vpop.f32.mrb[14].mxu0  ;;  %v2346_v12 = vpop.f32.mrb[13].mxu1 }
 0x104   : > { %v1829_v38 = vpack.c.bf16 %v2032_v36, %v2031_v27  ;;  %v699_v39 = vpop.f32.mrb[15].mxu0  ;;  %v1308_v49 = vmul.f32 %v2032_v36, %v2032_v36  ;;  %v2348_v17 = vpop.f32.mrb[14].mxu1 }
 0x105   : > { %v1368_v40 = vadd.f32 %v1367_v35, %v1305_v34  ;;  %v1824_v41 = vpack.c.bf16 %v699_v39, %v696_v30  ;;  %v1235_v42 = vadd.f32 %v1234_v33, %v699_v39  ;;  %v1306_v43 = vmul.f32 %v699_v39, %v699_v39  ;;  %v2352_v20 = vpop.f32.mrb[15].mxu1 }
 0x106   : > { %1957 = vst [vmem:[%s2290_s29 + $0x38] sm:$0xff] %v1829_v38   ;;  %v1909_v19 = vpack.c.bf16 %v2348_v17, %v2344_v11 }
 0x107   : > { %1956 = vst [vmem:[%s2290_s29 + $0x30] sm:$0xff] %v1824_v41   ;;  %v1236_v45 = vadd.f32 %v2031_v27, %v1235_v42  ;;  %v1369_v46 = vadd.f32 %v1368_v40, %v1306_v43  ;;  %v1904_v27 = vpack.c.bf16 %v2352_v20, %v2346_v12 }
 0x108   : > { %1973 = vst [vmem:[%s2290_s29 + $0xb8] sm:$0xff] %v1909_v19  }
 0x109   : > { %v1370_v50 = vadd.f32 %v1369_v46, %v1307_v44  ;;  %v2035_v51 = vpop.f32.mrb[16].mxu0  ;;  %v1237_v52 = vadd.f32 %v2032_v36, %v1236_v45  ;;  %1972 = vst [vmem:[%s2290_s29 + $0xb0] sm:$0xff] %v1904_v27  }
 0x10a   : > { %v712_v54 = vpop.f32.mrb[17].mxu0  ;;  %v1311_v7 = vmul.f32 %v2035_v51, %v2035_v51  ;;  %v2360_v39 = vpop.f32.mrb[16].mxu1 }
 0x10b   : > { %v1238_v57 = vadd.f32 %v1237_v52, %v712_v54  ;;  %v1309_v58 = vmul.f32 %v712_v54, %v712_v54  ;;  %v1371_v59 = vadd.f32 %v1370_v50, %v1308_v49  ;;  %v2036_v60 = vpop.f32.mrb[18].mxu0  ;;  %v2362_v40 = vpop.f32.mrb[17].mxu1 }
 0x10c   : > { %v1839_v62 = vpack.c.bf16 %v2036_v60, %v2035_v51  ;;  %v715_v1 = vpop.f32.mrb[19].mxu0  ;;  %v1312_v13 = vmul.f32 %v2036_v60, %v2036_v60  ;;  %v2364_v45 = vpop.f32.mrb[18].mxu1 }
 0x10d   : > { %v1372_v2 = vadd.f32 %v1371_v59, %v1309_v58  ;;  %v1834_v3 = vpack.c.bf16 %v715_v1, %v712_v54  ;;  %v1239_v4 = vadd.f32 %v1238_v57, %v715_v1  ;;  %v1310_v6 = vmul.f32 %v715_v1, %v715_v1  ;;  %v2368_v50 = vpop.f32.mrb[19].mxu1 }
 0x10e   : > { %1959 = vst [vmem:[%s2290_s29 + $0x48] sm:$0xff] %v1839_v62   ;;  %v1919_v49 = vpack.c.bf16 %v2364_v45, %v2360_v39  ;;  %v1914_v57 = vpack.c.bf16 %v2368_v50, %v2362_v40 }
 0x10f   : > { %1958 = vst [vmem:[%s2290_s29 + $0x40] sm:$0xff] %v1834_v3   ;;  %v1240_v9 = vadd.f32 %v2035_v51, %v1239_v4  ;;  %v1373_v10 = vadd.f32 %v1372_v2, %v1310_v6 }
 0x110   : > { %1975 = vst [vmem:[%s2290_s29 + $0xc8] sm:$0xff] %v1919_v49   ;;  %1974 = vst [vmem:[%s2290_s29 + $0xc0] sm:$0xff] %v1914_v57   ;;  %v1325_v49 = vmul.f32 %v2298_v0, %v2298_v0 }
 0x111   : > { %v1374_v14 = vadd.f32 %v1373_v10, %v1311_v7  ;;  %v2039_v15 = vpop.f32.mrb[20].mxu0  ;;  %v1241_v16 = vadd.f32 %v2036_v60, %v1240_v9 }
 0x112   : > { %v728_v18 = vpop.f32.mrb[21].mxu0  ;;  %v1315_v36 = vmul.f32 %v2039_v15, %v2039_v15  ;;  %v2376_v6 = vpop.f32.mrb[20].mxu1 }
 0x113   : > { %v1242_v21 = vadd.f32 %v1241_v16, %v728_v18  ;;  %v1313_v22 = vmul.f32 %v728_v18, %v728_v18  ;;  %v1375_v25 = vadd.f32 %v1374_v14, %v1312_v13  ;;  %v2040_v26 = vpop.f32.mrb[22].mxu0  ;;  %v2378_v7 = vpop.f32.mrb[21].mxu1 }
 0x114   : > { %v1849_v28 = vpack.c.bf16 %v2040_v26, %v2039_v15  ;;  %v731_v30 = vpop.f32.mrb[23].mxu0  ;;  %v1316_v41 = vmul.f32 %v2040_v26, %v2040_v26 }
 0x115   : > { %v1376_v31 = vadd.f32 %v1375_v25, %v1313_v22  ;;  %v1844_v33 = vpack.c.bf16 %v731_v30, %v728_v18  ;;  %v1243_v34 = vadd.f32 %v1242_v21, %v731_v30  ;;  %v1314_v35 = vmul.f32 %v731_v30, %v731_v30 }
 0x116   : > { %1961 = vst [vmem:[%s2290_s29 + $0x58] sm:$0xff] %v1849_v28  }
 0x117   : > { %1960 = vst [vmem:[%s2290_s29 + $0x50] sm:$0xff] %v1844_v33   ;;  %v1244_v37 = vadd.f32 %v2039_v15, %v1243_v34  ;;  %v1377_v38 = vadd.f32 %v1376_v31, %v1314_v35  ;;  %v2380_v15 = vpop.f32.mrb[22].mxu1 }
 0x118   : > { %v1929_v18 = vpack.c.bf16 %v2380_v15, %v2376_v6  ;;  %v2384_v19 = vpop.f32.mrb[23].mxu1 }
 0x119   : > { %v1378_v42 = vadd.f32 %v1377_v38, %v1315_v36  ;;  %v2043_v43 = vpop.f32.mrb[24].mxu0  ;;  %v1245_v44 = vadd.f32 %v2040_v26, %v1244_v37  ;;  %v1924_v27 = vpack.c.bf16 %v2384_v19, %v2378_v7 }
 0x11a   : > { %v744_v46 = vpop.f32.mrb[25].mxu0  ;;  %v1319_v2 = vmul.f32 %v2043_v43, %v2043_v43  ;;  %1977 = vst [vmem:[%s2290_s29 + $0xd8] sm:$0xff] %v1929_v18  }
 0x11b   : > { %v1246_v51 = vadd.f32 %v1245_v44, %v744_v46  ;;  %v1317_v52 = vmul.f32 %v744_v46, %v744_v46  ;;  %v1379_v54 = vadd.f32 %v1378_v42, %v1316_v41  ;;  %v2044_v55 = vpop.f32.mrb[26].mxu0  ;;  %1976 = vst [vmem:[%s2290_s29 + $0xd0] sm:$0xff] %v1924_v27   ;;  %v2392_v41 = vpop.f32.mrb[24].mxu1 }
 0x11c   : > { %v1859_v58 = vpack.c.bf16 %v2044_v55, %v2043_v43  ;;  %v747_v59 = vpop.f32.mrb[27].mxu0  ;;  %v1320_v9 = vmul.f32 %v2044_v55, %v2044_v55  ;;  %v2394_v42 = vpop.f32.mrb[25].mxu1 }
 0x11d   : > { %v1380_v60 = vadd.f32 %v1379_v54, %v1317_v52  ;;  %v1854_v61 = vpack.c.bf16 %v747_v59, %v744_v46  ;;  %v1247_v62 = vadd.f32 %v1246_v51, %v747_v59  ;;  %v1318_v1 = vmul.f32 %v747_v59, %v747_v59  ;;  %v2398_v51 = vpop.f32.mrb[26].mxu1 }
 0x11e   : > { %1963 = vst [vmem:[%s2290_s29 + $0x68] sm:$0xff] %v1859_v58   ;;  %v1939_v52 = vpack.c.bf16 %v2398_v51, %v2392_v41  ;;  %v2402_v54 = vpop.f32.mrb[27].mxu1 }
 0x11f   : > { %1962 = vst [vmem:[%s2290_s29 + $0x60] sm:$0xff] %v1854_v61   ;;  %v1248_v3 = vadd.f32 %v2043_v43, %v1247_v62  ;;  %v1381_v4 = vadd.f32 %v1380_v60, %v1318_v1  ;;  %v1934_v58 = vpack.c.bf16 %v2402_v54, %v2394_v42  ;;  %v1326_v61 = vmul.f32 %v2304_v8, %v2304_v8 }
 0x120   : > { %1979 = vst [vmem:[%s2290_s29 + $0xe8] sm:$0xff] %v1939_v52   ;;  %v1327_v62 = vmul.f32 %v2296_v63, %v2296_v63 }
 0x121   : > { %v1382_v10 = vadd.f32 %v1381_v4, %v1319_v2  ;;  %v2047_v13 = vpop.f32.mrb[28].mxu0  ;;  %v1249_v14 = vadd.f32 %v2044_v55, %v1248_v3  ;;  %1978 = vst [vmem:[%s2290_s29 + $0xe0] sm:$0xff] %v1934_v58   ;;  %v1328_v4 = vmul.f32 %v2300_v5, %v2300_v5 }
 0x122   : > { %v760_v16 = vpop.f32.mrb[29].mxu0  ;;  %v1323_v36 = vmul.f32 %v2047_v13, %v2047_v13 }
 0x123   : > { %v1250_v21 = vadd.f32 %v1249_v14, %v760_v16  ;;  %v1321_v22 = vmul.f32 %v760_v16, %v760_v16  ;;  %v1383_v25 = vadd.f32 %v1382_v10, %v1320_v9  ;;  %v2048_v26 = vpop.f32.mrb[30].mxu0 }
 0x124   : > { %v1869_v28 = vpack.c.bf16 %v2048_v26, %v2047_v13  ;;  %v763_v30 = vpop.f32.mrb[31].mxu0  ;;  %v1324_v43 = vmul.f32 %v2048_v26, %v2048_v26 }
 0x125   : > { %v1384_v31 = vadd.f32 %v1383_v25, %v1321_v22  ;;  %v1864_v33 = vpack.c.bf16 %v763_v30, %v760_v16  ;;  %v1251_v34 = vadd.f32 %v1250_v21, %v763_v30  ;;  %v1322_v35 = vmul.f32 %v763_v30, %v763_v30 }
 0x126   : > { %1965 = vst [vmem:[%s2290_s29 + $0x78] sm:$0xff] %v1869_v28   ;;  %v1330_v25 = vmul.f32 %v2320_v32, %v2320_v32 }
 0x127   : > { %1964 = vst [vmem:[%s2290_s29 + $0x70] sm:$0xff] %v1864_v33   ;;  %v1252_v37 = vadd.f32 %v2047_v13, %v1251_v34  ;;  %v1385_v38 = vadd.f32 %v1384_v31, %v1322_v35  ;;  %v1333_v33 = vmul.f32 %v2330_v48, %v2330_v48 }
 0x129   : > { %v1386_v44 = vadd.f32 %v1385_v38, %v1323_v36  ;;  %v1253_v46 = vadd.f32 %v2048_v26, %v1252_v37  ;;  %v1331_v26 = vmul.f32 %v2312_v23, %v2312_v23  ;;  %v1334_v37 = vmul.f32 %v2336_v56, %v2336_v56 }
 0x12b   : > { %v1254_v55 = vadd.f32 %v1253_v46, %v2298_v0  ;;  %v1387_v57 = vadd.f32 %v1386_v44, %v1324_v43  ;;  %v2415_v0 = vpop.f32.mrb[28].mxu1 }
 0x12c   : > { %v2417_v3 = vpop.f32.mrb[29].mxu1 }
 0x12d   : > { %v1388_v59 = vadd.f32 %v1387_v57, %v1325_v49  ;;  %v1255_v60 = vadd.f32 %v1254_v55, %v2304_v8  ;;  %v1329_v8 = vmul.f32 %v2314_v24, %v2314_v24  ;;  %v2424_v13 = vpop.f32.mrb[30].mxu1  ;;  %v1338_v57 = vmul.f32 %v2352_v20, %v2352_v20 }
 0x12e   : > { %v2428_v14 = vpop.f32.mrb[31].mxu1 }
 0x12f   : > { %v1256_v1 = vadd.f32 %v2296_v63, %v1255_v60  ;;  %v1389_v2 = vadd.f32 %v1388_v59, %v1326_v61  ;;  %v1949_v63 = vpack.c.bf16 %v2424_v13, %v2415_v0  ;;  %v1944_v21 = vpack.c.bf16 %v2428_v14, %v2417_v3 }
 0x131   : > { %v1390_v9 = vadd.f32 %v1389_v2, %v1327_v62  ;;  %v1257_v10 = vadd.f32 %v2300_v5, %v1256_v1  ;;  %1981 = vst [vmem:[%s2290_s29 + $0xf8] sm:$0xff] %v1949_v63   ;;  %1980 = vst [vmem:[%s2290_s29 + $0xf0] sm:$0xff] %v1944_v21  }
 0x133   : > { %v1258_v16 = vadd.f32 %v1257_v10, %v2314_v24  ;;  %v1391_v18 = vadd.f32 %v1390_v9, %v1328_v4  ;;  %v1332_v24 = vmul.f32 %v2316_v29, %v2316_v29  ;;  %v1342_v4 = vmul.f32 %v2368_v50, %v2368_v50 }
 0x135   : > { %v1392_v22 = vadd.f32 %v1391_v18, %v1329_v8  ;;  %v1259_v5 = vadd.f32 %v1258_v16, %v2320_v32 }
 0x137   : > { %v1260_v27 = vadd.f32 %v2312_v23, %v1259_v5  ;;  %v1393_v28 = vadd.f32 %v1392_v22, %v1330_v25  ;;  %v1335_v23 = vmul.f32 %v2328_v47, %v2328_v47  ;;  %v1346_v22 = vmul.f32 %v2384_v19, %v2384_v19 }
 0x139   : > { %v1394_v30 = vadd.f32 %v1393_v28, %v1331_v26  ;;  %v1261_v31 = vadd.f32 %v2316_v29, %v1260_v27  ;;  %v1336_v29 = vmul.f32 %v2332_v53, %v2332_v53 }
 0x13b   : > { %v1262_v34 = vadd.f32 %v1261_v31, %v2330_v48  ;;  %v1395_v35 = vadd.f32 %v1394_v30, %v1332_v24  ;;  %v1337_v48 = vmul.f32 %v2346_v12, %v2346_v12  ;;  %v1350_v31 = vmul.f32 %v2402_v54, %v2402_v54 }
 0x13d   : > { %v1396_v32 = vadd.f32 %v1395_v35, %v1333_v33  ;;  %v1263_v36 = vadd.f32 %v1262_v34, %v2336_v56 }
 0x13f   : > { %v1264_v38 = vadd.f32 %v2328_v47, %v1263_v36  ;;  %v1397_v43 = vadd.f32 %v1396_v32, %v1334_v37  ;;  %v1339_v47 = vmul.f32 %v2344_v11, %v2344_v11 }
 0x141   : > { %v1398_v44 = vadd.f32 %v1397_v43, %v1335_v23  ;;  %v1265_v46 = vadd.f32 %v2332_v53, %v1264_v38  ;;  %v1340_v53 = vmul.f32 %v2348_v17, %v2348_v17  ;;  %v1354_v38 = vmul.f32 %v2428_v14, %v2428_v14 }
 0x143   : > { %v1266_v49 = vadd.f32 %v1265_v46, %v2346_v12  ;;  %v1399_v52 = vadd.f32 %v1398_v44, %v1336_v29  ;;  %v1341_v12 = vmul.f32 %v2362_v40, %v2362_v40 }
 0x145   : > { %v1400_v55 = vadd.f32 %v1399_v52, %v1337_v48  ;;  %v1267_v56 = vadd.f32 %v1266_v49, %v2352_v20 }
 0x147   : > { %v1268_v58 = vadd.f32 %v2344_v11, %v1267_v56  ;;  %v1401_v59 = vadd.f32 %v1400_v55, %v1338_v57  ;;  %v1343_v11 = vmul.f32 %v2360_v39, %v2360_v39 }
 0x149   : > { %v1402_v60 = vadd.f32 %v1401_v59, %v1339_v47  ;;  %v1269_v61 = vadd.f32 %v2348_v17, %v1268_v58  ;;  %v1344_v17 = vmul.f32 %v2364_v45, %v2364_v45 }
 0x14b   : > { %v1270_v62 = vadd.f32 %v1269_v61, %v2362_v40  ;;  %v1403_v1 = vadd.f32 %v1402_v60, %v1340_v53  ;;  %v1345_v40 = vmul.f32 %v2378_v7, %v2378_v7 }
 0x14d   : > { %v1404_v2 = vadd.f32 %v1403_v1, %v1341_v12  ;;  %v1271_v20 = vadd.f32 %v1270_v62, %v2368_v50 }
 0x14f   : > { %v1272_v9 = vadd.f32 %v2360_v39, %v1271_v20  ;;  %v1405_v10 = vadd.f32 %v1404_v2, %v1342_v4  ;;  %v1347_v39 = vmul.f32 %v2376_v6, %v2376_v6 }
 0x151   : > { %v1406_v8 = vadd.f32 %v1405_v10, %v1343_v11  ;;  %v1273_v63 = vadd.f32 %v2364_v45, %v1272_v9  ;;  %v1348_v45 = vmul.f32 %v2380_v15, %v2380_v15 }
 0x153   : > { %v1274_v16 = vadd.f32 %v1273_v63, %v2378_v7  ;;  %v1407_v18 = vadd.f32 %v1406_v8, %v1344_v17  ;;  %v1349_v7 = vmul.f32 %v2394_v42, %v2394_v42 }
 0x155   : > { %v1408_v21 = vadd.f32 %v1407_v18, %v1345_v40  ;;  %v1275_v50 = vadd.f32 %v1274_v16, %v2384_v19 }
 0x157   : > { %v1276_v5 = vadd.f32 %v2376_v6, %v1275_v50  ;;  %v1409_v25 = vadd.f32 %v1408_v21, %v1346_v22  ;;  %v1351_v6 = vmul.f32 %v2392_v41, %v2392_v41 }
 0x159   : > { %v1410_v26 = vadd.f32 %v1409_v25, %v1347_v39  ;;  %v1277_v27 = vadd.f32 %v2380_v15, %v1276_v5  ;;  %v1352_v15 = vmul.f32 %v2398_v51, %v2398_v51 }
 0x15b   : > { %v1278_v28 = vadd.f32 %v1277_v27, %v2394_v42  ;;  %v1411_v24 = vadd.f32 %v1410_v26, %v1348_v45  ;;  %v1353_v42 = vmul.f32 %v2417_v3, %v2417_v3 }
 0x15d   : > { %v1412_v30 = vadd.f32 %v1411_v24, %v1349_v7  ;;  %v1279_v19 = vadd.f32 %v1278_v28, %v2402_v54 }
 0x15f   : > { %v1280_v33 = vadd.f32 %v2392_v41, %v1279_v19  ;;  %v1413_v34 = vadd.f32 %v1412_v30, %v1350_v31  ;;  %v1355_v41 = vmul.f32 %v2415_v0, %v2415_v0 }
 0x161   : > { %v1414_v35 = vadd.f32 %v1413_v34, %v1351_v6  ;;  %v1281_v32 = vadd.f32 %v2398_v51, %v1280_v33  ;;  %v1356_v51 = vmul.f32 %v2424_v13, %v2424_v13 }
 0x163   : > { %v1282_v36 = vadd.f32 %v1281_v32, %v2417_v3  ;;  %v1415_v37 = vadd.f32 %v1414_v35, %v1352_v15 }
 0x165   : > { %v1416_v23 = vadd.f32 %v1415_v37, %v1353_v42  ;;  %v1283_v54 = vadd.f32 %v1282_v36, %v2428_v14 }
 0x167   : > { %v1284_v43 = vadd.f32 %v2415_v0, %v1283_v54  ;;  %v1417_v29 = vadd.f32 %v1416_v23, %v1354_v38 }
 0x169   : > { %v1285_v3 = vadd.f32 %v2424_v13, %v1284_v43  ;;  %v1418_v44 = vadd.f32 %v1417_v29, %v1355_v41 }
 0x16b   : > { %v1286_v46 = vrot.slane %v1285_v3, 4  ;;  %v1419_v48 = vadd.f32 %v1418_v44, %v1356_v51 }
 0x16d   : > { %v1287_v49 = vadd.f32 %v1286_v46, %v1285_v3  ;;  %v1420_v52 = vrot.slane %v1419_v48, 4 }
 0x16f   : > { %v1288_v55 = vrot.slane %v1287_v49, 2  ;;  %v1421_v14 = vadd.f32 %v1420_v52, %v1419_v48 }
 0x171   : > { %v1289_v56 = vadd.f32 %v1288_v55, %v1287_v49  ;;  %v1422_v57 = vrot.slane %v1421_v14, 2 }
 0x173   : > { %v1290_v47 = vrot.slane %v1289_v56, 1  ;;  %v1423_v58 = vadd.f32 %v1422_v57, %v1421_v14 }
 0x175   : > { %v1291_v0 = vadd.f32 %v1290_v47, %v1289_v56  ;;  %v1424_v59 = vrot.slane %v1423_v58, 1 }
 0x177   : > { %1292 = vst [vmem:[%s277_s6] sm:$0x1] %v1291_v0  ;;  %v1425_v13 = vadd.f32 %v1424_v59, %v1423_v58 }
 0x179   : > { %1426 = vst [vmem:[%s282_s9] sm:$0x1] %v1425_v13 }
 0x17a PF: > { %s15_s17 = sadd.s32 1, %s2162_s17   ;;  %s2538_s15 = smov %s2158_s16 }
 0x17b   : > { %p12_p5 = scmp.ge.s32.totalorder %s15_s17, 6   ;;  %s2539_s16 = smov %s2541_s18 }
 0x17d   :  { %14 = sbr.rel (!%p12_p5) target bundleno = 2 (0x2), region = 85 }

// kernel: basic_upsample_block.3
= control target key start
LH: loop header
LB: loop body
LE: loop exit
PB: predicated region body
PF: predicated region fallthrough
CT: control target
= control target key end

     0   :  { %s1640_s12 = smov 0   ;;  %s1642_s13 = smov 0   ;;  %s2010_s0 = inlined_call_operand.vmem [shape: bf16[4,512,128], index: 0, kind: input, shape index: {}, may-alias: {0,3}]   ;;  %s2011_s1 = inlined_call_operand.vmem [shape: f32[1,1,128], index: 1, kind: input, shape index: {}]   ;;  %s2012_s2 = inlined_call_operand.vmem [shape: f32[1,1,128], index: 2, kind: input, shape index: {}]   ;;  %s2013_s3 = inlined_call_operand.vmem [shape: bf16[4,512,128], index: 3, kind: output, shape index: {}, may-alias: {0,3}]  }
   0x1   :  { %s1644_s14 = smov 0  }
   0x2 LB: > { %s25_s15 = sadd.s32 1, %s1614_s13  ;;  %p1083_p0 = scmp.ge.s32.totalorder %s1618_s14, 1  ;;  %s1618_s14 = sphi %s1644_s14, %s13_s14   ;;  %s1614_s13 = sphi %s1642_s13, %s2015_s13   ;;  %s1610_s12 = sphi %s1640_s12, %s2014_s12  }
   0x3   : > { %p27_p1 = scmp.ge.s32.totalorder %s25_s15, 4  ;;  %p158_p2 = scmp.lt.s32.totalorder %s1618_s14, 5 }
   0x5   : > { %s2017_s15 = smov (%p27_p1, %s25_s15), 0  ;;  %p159_p3 = pnand %p1083_p0, %p158_p2 }
   0x6   : > { %p191_p4 = scmp.lt.s32.totalorder (!%p159_p3), %s1610_s12, 3  ;;  %v1671_v0 = vld [vmem:[%s2011_s1] ss:$0 sm:$0xff] (!%p159_p3) }
   0x7   : > { %162 = sbr.rel (%p159_p3) target bundleno = 126 (0x7e), region = 32  ;;  %v1680_v9 = vld [vmem:[%s2012_s2] ss:$0 sm:$0xff] (!%p159_p3) }
   0xe   : > { %s2019_s12 = smov (!%p191_p4, %s1610_s12), 3 }
   0xf   : > { %s1156_s16 = sshll.u32 %s2019_s12, 8 }
  0x10   : > { %s1666_s19 = scalar_lea.vmem %s2010_s0, %s1156_s16  ;;  %s1718_s26 = scalar_lea.vmem %s2013_s3, %s1156_s16 }
  0x11   : > { %v1223_v1 = vld [vmem:[%s1666_s19] sm:$0xff]   ;;  %v1510_v2 = vld [vmem:[%s1666_s19 + $0x8] sm:$0xff]   ;;  %v1511_v3 = vld [vmem:[%s1666_s19 + $0x10] sm:$0xff]  }
  0x12   : > { %v1224_v4 = vunpack.c.l.bf16 %v1223_v1  ;;  %v1225_v5 = vunpack.c.h.bf16 %v1223_v1  ;;  %v1512_v6 = vld [vmem:[%s1666_s19 + $0x18] sm:$0xff]   ;;  %v1228_v7 = vunpack.c.l.bf16 %v1510_v2  ;;  %v1229_v8 = vunpack.c.h.bf16 %v1510_v2  ;;  %v1513_v18 = vld [vmem:[%s1666_s19 + $0x20] sm:$0xff]   ;;  %v1692_v23 = vld [vmem:[%s1666_s19 + $0x28] sm:$0xff]  }
  0x13   : > { %v1232_v10 = vunpack.c.l.bf16 %v1511_v3  ;;  %v1233_v11 = vunpack.c.h.bf16 %v1511_v3  ;;  %v1236_v12 = vunpack.c.l.bf16 %v1512_v6  ;;  %v1237_v13 = vunpack.c.h.bf16 %v1512_v6  ;;  %v1710_v39 = vld [vmem:[%s1666_s19 + $0x30] sm:$0xff]   ;;  %v1721_v44 = vld [vmem:[%s1666_s19 + $0x38] sm:$0xff]   ;;  %v1724_v45 = vld [vmem:[%s1666_s19 + $0x40] sm:$0xff]  }
  0x14   : > { %v345_v14 = vmul.f32 %v1224_v4, %v1671_v0  ;;  %v346_v15 = vmul.f32 %v1225_v5, %v1671_v0  ;;  %v347_v16 = vmul.f32 %v1228_v7, %v1671_v0  ;;  %v348_v17 = vmul.f32 %v1229_v8, %v1671_v0  ;;  %v1727_v46 = vld [vmem:[%s1666_s19 + $0x48] sm:$0xff]   ;;  %v1730_v47 = vld [vmem:[%s1666_s19 + $0x50] sm:$0xff]   ;;  %v1733_v48 = vld [vmem:[%s1666_s19 + $0x58] sm:$0xff]  }
  0x15   : > { %v349_v19 = vmul.f32 %v1232_v10, %v1671_v0  ;;  %v350_v20 = vmul.f32 %v1233_v11, %v1671_v0  ;;  %v351_v21 = vmul.f32 %v1236_v12, %v1671_v0  ;;  %v352_v22 = vmul.f32 %v1237_v13, %v1671_v0  ;;  %v1736_v49 = vld [vmem:[%s1666_s19 + $0x60] sm:$0xff]   ;;  %v1739_v50 = vld [vmem:[%s1666_s19 + $0x68] sm:$0xff]   ;;  %v1742_v51 = vld [vmem:[%s1666_s19 + $0x70] sm:$0xff]  }
  0x16   : > { %v416_v24 = vadd.f32 %v1680_v9, %v345_v14  ;;  %v417_v25 = vadd.f32 %v1680_v9, %v346_v15  ;;  %v418_v26 = vadd.f32 %v1680_v9, %v347_v16  ;;  %v419_v27 = vadd.f32 %v1680_v9, %v348_v17  ;;  %v1745_v52 = vld [vmem:[%s1666_s19 + $0x78] sm:$0xff]   ;;  %v1748_v53 = vld [vmem:[%s1666_s19 + $0x80] sm:$0xff]   ;;  %v1751_v54 = vld [vmem:[%s1666_s19 + $0x88] sm:$0xff]  }
  0x17   : > { %v420_v28 = vadd.f32 %v1680_v9, %v349_v19  ;;  %v421_v29 = vadd.f32 %v1680_v9, %v350_v20  ;;  %v1701_v30 = vadd.f32 %v1680_v9, %v351_v21  ;;  %v1704_v31 = vadd.f32 %v1680_v9, %v352_v22  ;;  %v1754_v55 = vld [vmem:[%s1666_s19 + $0x90] sm:$0xff]   ;;  %v1757_v56 = vld [vmem:[%s1666_s19 + $0x98] sm:$0xff]   ;;  %v1760_v57 = vld [vmem:[%s1666_s19 + $0xa0] sm:$0xff]  }
  0x18   : > { %vm480_vm0 = vcmp.ge.f32.partialorder %v416_v24, 0.0  ;;  %vm481_vm1 = vcmp.ge.f32.partialorder %v417_v25, 0.0  ;;  %vm482_vm2 = vcmp.ge.f32.partialorder %v418_v26, 0.0  ;;  %v1240_v32 = vunpack.c.l.bf16 %v1513_v18  ;;  %v1763_v58 = vld [vmem:[%s1666_s19 + $0xa8] sm:$0xff]   ;;  %v1766_v59 = vld [vmem:[%s1666_s19 + $0xb0] sm:$0xff]   ;;  %v1769_v60 = vld [vmem:[%s1666_s19 + $0xb8] sm:$0xff]  }
  0x19   : > { %v544_v33 = vmul.f32 0.2, %v416_v24  ;;  %vm483_vm3 = vcmp.ge.f32.partialorder %v419_v27, 0.0  ;;  %v1241_v34 = vunpack.c.h.bf16 %v1513_v18  ;;  %v1244_v35 = vunpack.c.l.bf16 %v1692_v23  ;;  %v1772_v61 = vld [vmem:[%s1666_s19 + $0xc0] sm:$0xff]   ;;  %v1775_v62 = vld [vmem:[%s1666_s19 + $0xc8] sm:$0xff]   ;;  %v1779_v3 = vld [vmem:[%s1666_s19 + $0xd0] sm:$0xff]  }
  0x1a   : > { %v545_v36 = vmul.f32 0.2, %v417_v25  ;;  %vm484_vm4 = vcmp.ge.f32.partialorder %v420_v28, 0.0  ;;  %v353_v37 = vmul.f32 %v1240_v32, %v1671_v0  ;;  %v1245_v38 = vunpack.c.h.bf16 %v1692_v23  ;;  %v1782_v4 = vld [vmem:[%s1666_s19 + $0xd8] sm:$0xff]   ;;  %v1785_v5 = vld [vmem:[%s1666_s19 + $0xe0] sm:$0xff]   ;;  %v1791_v10 = vld [vmem:[%s1666_s19 + $0xe8] sm:$0xff]  }
  0x1b   : > { %v608_v40 = vsel %vm480_vm0, %v416_v24, %v544_v33  ;;  %v546_v41 = vmul.f32 0.2, %v418_v26  ;;  %v547_v42 = vmul.f32 0.2, %v419_v27  ;;  %v354_v43 = vmul.f32 %v1241_v34, %v1671_v0  ;;  %v1794_v11 = vld [vmem:[%s1666_s19 + $0xf0] sm:$0xff]   ;;  %v1797_v12 = vld [vmem:[%s1666_s19 + $0xf8] sm:$0xff]  }
  0x1c   : > { %v609_v63 = vsel %vm481_vm1, %v417_v25, %v545_v36  ;;  %vm485_vm5 = vcmp.ge.f32.partialorder %v421_v29, 0.0  ;;  %v548_v1 = vmul.f32 0.2, %v420_v28  ;;  %v549_v2 = vmul.f32 0.2, %v421_v29 }
  0x1d   : > { %v1353_v6 = vpack.c.bf16 %v609_v63, %v608_v40  ;;  %v610_v7 = vsel %vm482_vm2, %v418_v26, %v546_v41  ;;  %v611_v8 = vsel %vm483_vm3, %v419_v27, %v547_v42  ;;  %vm486_vm6 = vcmp.ge.f32.partialorder %v1701_v30, 0.0 }
  0x1e   : > { %v1358_v13 = vpack.c.bf16 %v611_v8, %v610_v7  ;;  %v612_v14 = vsel %vm484_vm4, %v420_v28, %v548_v1  ;;  %v613_v15 = vsel %vm485_vm5, %v421_v29, %v549_v2  ;;  %vm487_vm7 = vcmp.ge.f32.partialorder %v1704_v31, 0.0 }
  0x1f   : > { %1354 = vst [vmem:[%s1718_s26] sm:$0xff] %v1353_v6   ;;  %v1363_v16 = vpack.c.bf16 %v613_v15, %v612_v14  ;;  %v550_v17 = vmul.f32 0.2, %v1701_v30  ;;  %v551_v18 = vmul.f32 0.2, %v1704_v31  ;;  %v424_v19 = vadd.f32 %v1680_v9, %v353_v37 }
  0x20   : > { %1541 = vst [vmem:[%s1718_s26 + $0x8] sm:$0xff] %v1358_v13   ;;  %v425_v20 = vadd.f32 %v1680_v9, %v354_v43  ;;  %v355_v21 = vmul.f32 %v1244_v35, %v1671_v0  ;;  %v356_v22 = vmul.f32 %v1245_v38, %v1671_v0  ;;  %v1248_v23 = vunpack.c.l.bf16 %v1710_v39 }
  0x21   : > { %1542 = vst [vmem:[%s1718_s26 + $0x10] sm:$0xff] %v1363_v16   ;;  %v614_v24 = vsel %vm486_vm6, %v1701_v30, %v550_v17  ;;  %v615_v25 = vsel %vm487_vm7, %v1704_v31, %v551_v18  ;;  %vm488_vm8 = vcmp.ge.f32.partialorder %v424_v19, 0.0  ;;  %v552_v26 = vmul.f32 0.2, %v424_v19 }
  0x22   : > { %v1368_v27 = vpack.c.bf16 %v615_v25, %v614_v24  ;;  %vm489_vm9 = vcmp.ge.f32.partialorder %v425_v20, 0.0  ;;  %v553_v28 = vmul.f32 0.2, %v425_v20  ;;  %v426_v29 = vadd.f32 %v1680_v9, %v355_v21 }
  0x23   : > { %v616_v32 = vsel %vm488_vm8, %v424_v19, %v552_v26  ;;  %v427_v33 = vadd.f32 %v1680_v9, %v356_v22  ;;  %v1249_v34 = vunpack.c.h.bf16 %v1710_v39  ;;  %v357_v35 = vmul.f32 %v1248_v23, %v1671_v0 }
  0x24   : > { %1543 = vst [vmem:[%s1718_s26 + $0x18] sm:$0xff] %v1368_v27   ;;  %v617_v36 = vsel %vm489_vm9, %v425_v20, %v553_v28  ;;  %vm490_vm10 = vcmp.ge.f32.partialorder %v426_v29, 0.0  ;;  %v554_v30 = vmul.f32 0.2, %v426_v29  ;;  %v1252_v31 = vunpack.c.l.bf16 %v1721_v44 }
  0x25   : > { %v1373_v37 = vpack.c.bf16 %v617_v36, %v616_v32  ;;  %vm491_vm11 = vcmp.ge.f32.partialorder %v427_v33, 0.0  ;;  %v555_v38 = vmul.f32 0.2, %v427_v33  ;;  %v358_v40 = vmul.f32 %v1249_v34, %v1671_v0 }
  0x26   : > { %v618_v41 = vsel %vm490_vm10, %v426_v29, %v554_v30  ;;  %v428_v42 = vadd.f32 %v1680_v9, %v357_v35  ;;  %v1253_v43 = vunpack.c.h.bf16 %v1721_v44  ;;  %v359_v39 = vmul.f32 %v1252_v31, %v1671_v0 }
  0x27   : > { %1544 = vst [vmem:[%s1718_s26 + $0x20] sm:$0xff] %v1373_v37   ;;  %v619_v63 = vsel %vm491_vm11, %v427_v33, %v555_v38  ;;  %v429_v1 = vadd.f32 %v1680_v9, %v358_v40  ;;  %v1256_v2 = vunpack.c.l.bf16 %v1724_v45  ;;  %v1257_v6 = vunpack.c.h.bf16 %v1724_v45 }
  0x28   : > { %v1378_v7 = vpack.c.bf16 %v619_v63, %v618_v41  ;;  %vm492_vm12 = vcmp.ge.f32.partialorder %v428_v42, 0.0  ;;  %v556_v8 = vmul.f32 0.2, %v428_v42  ;;  %v360_v13 = vmul.f32 %v1253_v43, %v1671_v0 }
  0x29   : > { %vm493_vm13 = vcmp.ge.f32.partialorder %v429_v1, 0.0  ;;  %v557_v14 = vmul.f32 0.2, %v429_v1  ;;  %v430_v15 = vadd.f32 %v1680_v9, %v359_v39  ;;  %v361_v44 = vmul.f32 %v1256_v2, %v1671_v0 }
  0x2a   : > { %1545 = vst [vmem:[%s1718_s26 + $0x28] sm:$0xff] %v1378_v7   ;;  %v620_v16 = vsel %vm492_vm12, %v428_v42, %v556_v8  ;;  %v431_v17 = vadd.f32 %v1680_v9, %v360_v13  ;;  %v362_v18 = vmul.f32 %v1257_v6, %v1671_v0  ;;  %v1260_v45 = vunpack.c.l.bf16 %v1727_v46 }
  0x2b   : > { %v621_v19 = vsel %vm493_vm13, %v429_v1, %v557_v14  ;;  %vm494_vm14 = vcmp.ge.f32.partialorder %v430_v15, 0.0  ;;  %v558_v20 = vmul.f32 0.2, %v430_v15  ;;  %v432_v21 = vadd.f32 %v1680_v9, %v361_v44 }
  0x2c   : > { %v1383_v22 = vpack.c.bf16 %v621_v19, %v620_v16  ;;  %vm495_vm15 = vcmp.ge.f32.partialorder %v431_v17, 0.0  ;;  %v559_v23 = vmul.f32 0.2, %v431_v17  ;;  %v433_v24 = vadd.f32 %v1680_v9, %v362_v18 }
  0x2d   : > { %v622_v25 = vsel %vm494_vm14, %v430_v15, %v558_v20  ;;  %vm496_vm0 = vcmp.ge.f32.partialorder %v432_v21, 0.0  ;;  %v560_v26 = vmul.f32 0.2, %v432_v21  ;;  %v1261_v27 = vunpack.c.h.bf16 %v1727_v46 }
  0x2e   : > { %1546 = vst [vmem:[%s1718_s26 + $0x30] sm:$0xff] %v1383_v22   ;;  %v623_v28 = vsel %vm495_vm15, %v431_v17, %v559_v23  ;;  %vm497_vm1 = vcmp.ge.f32.partialorder %v433_v24, 0.0  ;;  %v561_v29 = vmul.f32 0.2, %v433_v24  ;;  %v363_v32 = vmul.f32 %v1260_v45, %v1671_v0 }
  0x2f   : > { %v1388_v33 = vpack.c.bf16 %v623_v28, %v622_v25  ;;  %v624_v34 = vsel %vm496_vm0, %v432_v21, %v560_v26  ;;  %v364_v35 = vmul.f32 %v1261_v27, %v1671_v0  ;;  %v1264_v36 = vunpack.c.l.bf16 %v1730_v47 }
  0x30   : > { %v625_v30 = vsel %vm497_vm1, %v433_v24, %v561_v29  ;;  %v434_v31 = vadd.f32 %v1680_v9, %v363_v32  ;;  %v1265_v37 = vunpack.c.h.bf16 %v1730_v47  ;;  %v1268_v46 = vunpack.c.l.bf16 %v1733_v48 }
  0x31   : > { %1547 = vst [vmem:[%s1718_s26 + $0x38] sm:$0xff] %v1388_v33   ;;  %v1393_v38 = vpack.c.bf16 %v625_v30, %v624_v34  ;;  %v435_v40 = vadd.f32 %v1680_v9, %v364_v35  ;;  %v365_v41 = vmul.f32 %v1264_v36, %v1671_v0  ;;  %v1269_v42 = vunpack.c.h.bf16 %v1733_v48 }
  0x32   : > { %vm498_vm2 = vcmp.ge.f32.partialorder %v434_v31, 0.0  ;;  %v562_v43 = vmul.f32 0.2, %v434_v31  ;;  %v366_v39 = vmul.f32 %v1265_v37, %v1671_v0  ;;  %v367_v63 = vmul.f32 %v1268_v46, %v1671_v0 }
  0x33   : > { %1548 = vst [vmem:[%s1718_s26 + $0x40] sm:$0xff] %v1393_v38   ;;  %vm499_vm3 = vcmp.ge.f32.partialorder %v435_v40, 0.0  ;;  %v563_v1 = vmul.f32 0.2, %v435_v40  ;;  %v436_v47 = vadd.f32 %v1680_v9, %v365_v41  ;;  %v368_v2 = vmul.f32 %v1269_v42, %v1671_v0 }
  0x34   : > { %v626_v6 = vsel %vm498_vm2, %v434_v31, %v562_v43  ;;  %v437_v7 = vadd.f32 %v1680_v9, %v366_v39  ;;  %v438_v8 = vadd.f32 %v1680_v9, %v367_v63  ;;  %v1272_v48 = vunpack.c.l.bf16 %v1736_v49 }
  0x35   : > { %v627_v13 = vsel %vm499_vm3, %v435_v40, %v563_v1  ;;  %vm500_vm4 = vcmp.ge.f32.partialorder %v436_v47, 0.0  ;;  %v564_v14 = vmul.f32 0.2, %v436_v47  ;;  %v439_v15 = vadd.f32 %v1680_v9, %v368_v2 }
  0x36   : > { %v1398_v44 = vpack.c.bf16 %v627_v13, %v626_v6  ;;  %vm501_vm5 = vcmp.ge.f32.partialorder %v437_v7, 0.0  ;;  %v565_v16 = vmul.f32 0.2, %v437_v7  ;;  %vm502_vm6 = vcmp.ge.f32.partialorder %v438_v8, 0.0 }
  0x37   : > { %v628_v17 = vsel %vm500_vm4, %v436_v47, %v564_v14  ;;  %vm503_vm7 = vcmp.ge.f32.partialorder %v439_v15, 0.0  ;;  %v566_v18 = vmul.f32 0.2, %v438_v8  ;;  %v567_v45 = vmul.f32 0.2, %v439_v15 }
  0x38   : > { %1549 = vst [vmem:[%s1718_s26 + $0x48] sm:$0xff] %v1398_v44   ;;  %v629_v19 = vsel %vm501_vm5, %v437_v7, %v565_v16  ;;  %v1273_v20 = vunpack.c.h.bf16 %v1736_v49  ;;  %v369_v21 = vmul.f32 %v1272_v48, %v1671_v0  ;;  %v1276_v22 = vunpack.c.l.bf16 %v1739_v50 }
  0x39   : > { %v1403_v23 = vpack.c.bf16 %v629_v19, %v628_v17  ;;  %v630_v24 = vsel %vm502_vm6, %v438_v8, %v566_v18  ;;  %v631_v25 = vsel %vm503_vm7, %v439_v15, %v567_v45  ;;  %v1277_v26 = vunpack.c.h.bf16 %v1739_v50 }
  0x3a   : > { %v1408_v27 = vpack.c.bf16 %v631_v25, %v630_v24  ;;  %v370_v28 = vmul.f32 %v1273_v20, %v1671_v0  ;;  %v440_v29 = vadd.f32 %v1680_v9, %v369_v21  ;;  %v371_v32 = vmul.f32 %v1276_v22, %v1671_v0 }
  0x3b   : > { %1550 = vst [vmem:[%s1718_s26 + $0x50] sm:$0xff] %v1403_v23   ;;  %v372_v49 = vmul.f32 %v1277_v26, %v1671_v0  ;;  %v1280_v33 = vunpack.c.l.bf16 %v1742_v51  ;;  %v1281_v34 = vunpack.c.h.bf16 %v1742_v51  ;;  %v1284_v35 = vunpack.c.l.bf16 %v1745_v52 }
  0x3c   : > { %1551 = vst [vmem:[%s1718_s26 + $0x58] sm:$0xff] %v1408_v27   ;;  %v441_v36 = vadd.f32 %v1680_v9, %v370_v28  ;;  %vm504_vm8 = vcmp.ge.f32.partialorder %v440_v29, 0.0  ;;  %v568_v50 = vmul.f32 0.2, %v440_v29  ;;  %v442_v30 = vadd.f32 %v1680_v9, %v371_v32 }
  0x3d   : > { %v443_v31 = vadd.f32 %v1680_v9, %v372_v49  ;;  %v373_v37 = vmul.f32 %v1280_v33, %v1671_v0  ;;  %v374_v46 = vmul.f32 %v1281_v34, %v1671_v0  ;;  %v1285_v38 = vunpack.c.h.bf16 %v1745_v52 }
  0x3e   : > { %vm505_vm9 = vcmp.ge.f32.partialorder %v441_v36, 0.0  ;;  %v569_v40 = vmul.f32 0.2, %v441_v36  ;;  %v632_v51 = vsel %vm504_vm8, %v440_v29, %v568_v50  ;;  %vm506_vm10 = vcmp.ge.f32.partialorder %v442_v30, 0.0 }
  0x3f   : > { %vm507_vm11 = vcmp.ge.f32.partialorder %v443_v31, 0.0  ;;  %v570_v41 = vmul.f32 0.2, %v442_v30  ;;  %v571_v42 = vmul.f32 0.2, %v443_v31  ;;  %v444_v43 = vadd.f32 %v1680_v9, %v373_v37 }
  0x40   : > { %v633_v39 = vsel %vm505_vm9, %v441_v36, %v569_v40  ;;  %v445_v63 = vadd.f32 %v1680_v9, %v374_v46  ;;  %v375_v1 = vmul.f32 %v1284_v35, %v1671_v0  ;;  %v376_v47 = vmul.f32 %v1285_v38, %v1671_v0 }
  0x41   : > { %v1413_v2 = vpack.c.bf16 %v633_v39, %v632_v51  ;;  %v634_v52 = vsel %vm506_vm10, %v442_v30, %v570_v41  ;;  %v635_v6 = vsel %vm507_vm11, %v443_v31, %v571_v42  ;;  %vm508_vm12 = vcmp.ge.f32.partialorder %v444_v43, 0.0 }
  0x42   : > { %v1418_v7 = vpack.c.bf16 %v635_v6, %v634_v52  ;;  %vm509_vm13 = vcmp.ge.f32.partialorder %v445_v63, 0.0  ;;  %v572_v8 = vmul.f32 0.2, %v444_v43  ;;  %v573_v48 = vmul.f32 0.2, %v445_v63 }
  0x43   : > { %1552 = vst [vmem:[%s1718_s26 + $0x60] sm:$0xff] %v1413_v2   ;;  %v446_v13 = vadd.f32 %v1680_v9, %v375_v1  ;;  %v447_v14 = vadd.f32 %v1680_v9, %v376_v47  ;;  %v1288_v15 = vunpack.c.l.bf16 %v1748_v53  ;;  %v1289_v44 = vunpack.c.h.bf16 %v1748_v53 }
  0x44   : > { %1553 = vst [vmem:[%s1718_s26 + $0x68] sm:$0xff] %v1418_v7   ;;  %v636_v16 = vsel %vm508_vm12, %v444_v43, %v572_v8  ;;  %v637_v17 = vsel %vm509_vm13, %v445_v63, %v573_v48  ;;  %v1292_v18 = vunpack.c.l.bf16 %v1751_v54  ;;  %v1293_v45 = vunpack.c.h.bf16 %v1751_v54 }
  0x45   : > { %v1423_v19 = vpack.c.bf16 %v637_v17, %v636_v16  ;;  %vm510_vm14 = vcmp.ge.f32.partialorder %v446_v13, 0.0  ;;  %vm511_vm15 = vcmp.ge.f32.partialorder %v447_v14, 0.0  ;;  %v574_v20 = vmul.f32 0.2, %v446_v13 }
  0x46   : > { %v575_v21 = vmul.f32 0.2, %v447_v14  ;;  %v377_v22 = vmul.f32 %v1288_v15, %v1671_v0  ;;  %v378_v23 = vmul.f32 %v1289_v44, %v1671_v0  ;;  %v379_v24 = vmul.f32 %v1292_v18, %v1671_v0 }
  0x47   : > { %1554 = vst [vmem:[%s1718_s26 + $0x70] sm:$0xff] %v1423_v19   ;;  %v638_v53 = vsel %vm510_vm14, %v446_v13, %v574_v20  ;;  %v380_v25 = vmul.f32 %v1293_v45, %v1671_v0  ;;  %v1296_v26 = vunpack.c.l.bf16 %v1754_v55  ;;  %v1297_v54 = vunpack.c.h.bf16 %v1754_v55 }
  0x48   : > { %v639_v27 = vsel %vm511_vm15, %v447_v14, %v575_v21  ;;  %v448_v28 = vadd.f32 %v1680_v9, %v377_v22  ;;  %v449_v29 = vadd.f32 %v1680_v9, %v378_v23  ;;  %v450_v32 = vadd.f32 %v1680_v9, %v379_v24 }
  0x49   : > { %v1428_v49 = vpack.c.bf16 %v639_v27, %v638_v53  ;;  %v451_v33 = vadd.f32 %v1680_v9, %v380_v25  ;;  %v381_v34 = vmul.f32 %v1296_v26, %v1671_v0  ;;  %v382_v35 = vmul.f32 %v1297_v54, %v1671_v0 }
  0x4a   : > { %vm512_vm0 = vcmp.ge.f32.partialorder %v448_v28, 0.0  ;;  %vm513_vm1 = vcmp.ge.f32.partialorder %v449_v29, 0.0  ;;  %v576_v36 = vmul.f32 0.2, %v448_v28  ;;  %v577_v50 = vmul.f32 0.2, %v449_v29 }
  0x4b   : > { %1555 = vst [vmem:[%s1718_s26 + $0x78] sm:$0xff] %v1428_v49   ;;  %vm514_vm2 = vcmp.ge.f32.partialorder %v450_v32, 0.0  ;;  %vm515_vm3 = vcmp.ge.f32.partialorder %v451_v33, 0.0  ;;  %v578_v55 = vmul.f32 0.2, %v450_v32  ;;  %v452_v46 = vadd.f32 %v1680_v9, %v381_v34 }
  0x4c   : > { %v579_v30 = vmul.f32 0.2, %v451_v33  ;;  %v640_v31 = vsel %vm512_vm0, %v448_v28, %v576_v36  ;;  %v641_v37 = vsel %vm513_vm1, %v449_v29, %v577_v50  ;;  %v453_v38 = vadd.f32 %v1680_v9, %v382_v35 }
  0x4d   : > { %v1433_v40 = vpack.c.bf16 %v641_v37, %v640_v31  ;;  %v642_v51 = vsel %vm514_vm2, %v450_v32, %v578_v55  ;;  %v1300_v42 = vunpack.c.l.bf16 %v1757_v56  ;;  %vm516_vm4 = vcmp.ge.f32.partialorder %v452_v46, 0.0 }
  0x4e   : > { %v643_v41 = vsel %vm515_vm3, %v451_v33, %v579_v30  ;;  %vm517_vm5 = vcmp.ge.f32.partialorder %v453_v38, 0.0  ;;  %v580_v39 = vmul.f32 0.2, %v452_v46  ;;  %v581_v63 = vmul.f32 0.2, %v453_v38 }
  0x4f   : > { %v1438_v43 = vpack.c.bf16 %v643_v41, %v642_v51  ;;  %1556 = vst [vmem:[%s1718_s26 + $0x80] sm:$0xff] %v1433_v40   ;;  %v1301_v1 = vunpack.c.h.bf16 %v1757_v56  ;;  %v383_v47 = vmul.f32 %v1300_v42, %v1671_v0  ;;  %v1304_v2 = vunpack.c.l.bf16 %v1760_v57 }
  0x50   : > { %v644_v52 = vsel %vm516_vm4, %v452_v46, %v580_v39  ;;  %v1305_v6 = vunpack.c.h.bf16 %v1760_v57  ;;  %v1308_v7 = vunpack.c.l.bf16 %v1763_v58  ;;  %v1309_v8 = vunpack.c.h.bf16 %v1763_v58 }
  0x51   : > { %1557 = vst [vmem:[%s1718_s26 + $0x88] sm:$0xff] %v1438_v43   ;;  %v645_v48 = vsel %vm517_vm5, %v453_v38, %v581_v63  ;;  %v384_v13 = vmul.f32 %v1301_v1, %v1671_v0  ;;  %v454_v14 = vadd.f32 %v1680_v9, %v383_v47  ;;  %v385_v56 = vmul.f32 %v1304_v2, %v1671_v0 }
  0x52   : > { %v1443_v15 = vpack.c.bf16 %v645_v48, %v644_v52  ;;  %v386_v44 = vmul.f32 %v1305_v6, %v1671_v0  ;;  %v387_v16 = vmul.f32 %v1308_v7, %v1671_v0  ;;  %v388_v17 = vmul.f32 %v1309_v8, %v1671_v0 }
  0x53   : > { %v455_v57 = vadd.f32 %v1680_v9, %v384_v13  ;;  %vm518_vm6 = vcmp.ge.f32.partialorder %v454_v14, 0.0  ;;  %v582_v18 = vmul.f32 0.2, %v454_v14  ;;  %v456_v58 = vadd.f32 %v1680_v9, %v385_v56 }
  0x54   : > { %1558 = vst [vmem:[%s1718_s26 + $0x90] sm:$0xff] %v1443_v15   ;;  %v457_v45 = vadd.f32 %v1680_v9, %v386_v44  ;;  %v458_v19 = vadd.f32 %v1680_v9, %v387_v16  ;;  %v459_v20 = vadd.f32 %v1680_v9, %v388_v17  ;;  %v1312_v21 = vunpack.c.l.bf16 %v1766_v59 }
  0x55   : > { %vm519_vm7 = vcmp.ge.f32.partialorder %v455_v57, 0.0  ;;  %v583_v22 = vmul.f32 0.2, %v455_v57  ;;  %v646_v23 = vsel %vm518_vm6, %v454_v14, %v582_v18  ;;  %vm520_vm8 = vcmp.ge.f32.partialorder %v456_v58, 0.0 }
  0x56   : > { %vm521_vm9 = vcmp.ge.f32.partialorder %v457_v45, 0.0  ;;  %v584_v24 = vmul.f32 0.2, %v456_v58  ;;  %v585_v53 = vmul.f32 0.2, %v457_v45  ;;  %vm522_vm10 = vcmp.ge.f32.partialorder %v458_v19, 0.0 }
  0x57   : > { %v647_v25 = vsel %vm519_vm7, %v455_v57, %v583_v22  ;;  %vm523_vm11 = vcmp.ge.f32.partialorder %v459_v20, 0.0  ;;  %v586_v26 = vmul.f32 0.2, %v458_v19  ;;  %v587_v54 = vmul.f32 0.2, %v459_v20 }
  0x58   : > { %v1448_v27 = vpack.c.bf16 %v647_v25, %v646_v23  ;;  %v648_v28 = vsel %vm520_vm8, %v456_v58, %v584_v24  ;;  %v649_v29 = vsel %vm521_vm9, %v457_v45, %v585_v53  ;;  %v1313_v32 = vunpack.c.h.bf16 %v1766_v59 }
  0x59   : > { %v1453_v49 = vpack.c.bf16 %v649_v29, %v648_v28  ;;  %v650_v33 = vsel %vm522_vm10, %v458_v19, %v586_v26  ;;  %v651_v34 = vsel %vm523_vm11, %v459_v20, %v587_v54  ;;  %v389_v35 = vmul.f32 %v1312_v21, %v1671_v0 }
  0x5a   : > { %1559 = vst [vmem:[%s1718_s26 + $0x98] sm:$0xff] %v1448_v27   ;;  %v1458_v36 = vpack.c.bf16 %v651_v34, %v650_v33  ;;  %v390_v50 = vmul.f32 %v1313_v32, %v1671_v0  ;;  %v1316_v55 = vunpack.c.l.bf16 %v1769_v60  ;;  %v1317_v30 = vunpack.c.h.bf16 %v1769_v60 }
  0x5b   : > { %1560 = vst [vmem:[%s1718_s26 + $0xa0] sm:$0xff] %v1453_v49   ;;  %v460_v31 = vadd.f32 %v1680_v9, %v389_v35  ;;  %v1320_v37 = vunpack.c.l.bf16 %v1772_v61  ;;  %v1321_v59 = vunpack.c.h.bf16 %v1772_v61  ;;  %v1324_v46 = vunpack.c.l.bf16 %v1775_v62 }
  0x5c   : > { %1561 = vst [vmem:[%s1718_s26 + $0xa8] sm:$0xff] %v1458_v36   ;;  %v461_v38 = vadd.f32 %v1680_v9, %v390_v50  ;;  %v391_v40 = vmul.f32 %v1316_v55, %v1671_v0  ;;  %v392_v51 = vmul.f32 %v1317_v30, %v1671_v0  ;;  %v1325_v41 = vunpack.c.h.bf16 %v1775_v62 }
  0x5d   : > { %vm524_vm12 = vcmp.ge.f32.partialorder %v460_v31, 0.0  ;;  %v588_v60 = vmul.f32 0.2, %v460_v31  ;;  %v393_v42 = vmul.f32 %v1320_v37, %v1671_v0  ;;  %v394_v43 = vmul.f32 %v1321_v59, %v1671_v0 }
  0x5e   : > { %vm525_vm13 = vcmp.ge.f32.partialorder %v461_v38, 0.0  ;;  %v589_v39 = vmul.f32 0.2, %v461_v38  ;;  %v462_v61 = vadd.f32 %v1680_v9, %v391_v40  ;;  %v463_v63 = vadd.f32 %v1680_v9, %v392_v51 }
  0x5f   : > { %v652_v1 = vsel %vm524_vm12, %v460_v31, %v588_v60  ;;  %v464_v47 = vadd.f32 %v1680_v9, %v393_v42  ;;  %v465_v2 = vadd.f32 %v1680_v9, %v394_v43  ;;  %v395_v62 = vmul.f32 %v1324_v46, %v1671_v0 }
  0x60   : > { %v653_v52 = vsel %vm525_vm13, %v461_v38, %v589_v39  ;;  %vm526_vm14 = vcmp.ge.f32.partialorder %v462_v61, 0.0  ;;  %vm527_vm15 = vcmp.ge.f32.partialorder %v463_v63, 0.0  ;;  %v590_v6 = vmul.f32 0.2, %v462_v61 }
  0x61   : > { %v1463_v7 = vpack.c.bf16 %v653_v52, %v652_v1  ;;  %v591_v8 = vmul.f32 0.2, %v463_v63  ;;  %vm528_vm0 = vcmp.ge.f32.partialorder %v464_v47, 0.0  ;;  %vm529_vm1 = vcmp.ge.f32.partialorder %v465_v2, 0.0 }
  0x62   : > { %v654_v48 = vsel %vm526_vm14, %v462_v61, %v590_v6  ;;  %v592_v13 = vmul.f32 0.2, %v464_v47  ;;  %v593_v14 = vmul.f32 0.2, %v465_v2  ;;  %v396_v56 = vmul.f32 %v1325_v41, %v1671_v0 }
  0x63   : > { %1562 = vst [vmem:[%s1718_s26 + $0xb0] sm:$0xff] %v1463_v7   ;;  %v655_v15 = vsel %vm527_vm15, %v463_v63, %v591_v8  ;;  %v466_v44 = vadd.f32 %v1680_v9, %v395_v62  ;;  %v1328_v16 = vunpack.c.l.bf16 %v1779_v3  ;;  %v1329_v17 = vunpack.c.h.bf16 %v1779_v3 }
  0x64   : > { %v1468_v57 = vpack.c.bf16 %v655_v15, %v654_v48  ;;  %v656_v18 = vsel %vm528_vm0, %v464_v47, %v592_v13  ;;  %v657_v58 = vsel %vm529_vm1, %v465_v2, %v593_v14  ;;  %v467_v45 = vadd.f32 %v1680_v9, %v396_v56 }
  0x65   : > { %v1473_v19 = vpack.c.bf16 %v657_v58, %v656_v18  ;;  %vm530_vm2 = vcmp.ge.f32.partialorder %v466_v44, 0.0  ;;  %v594_v20 = vmul.f32 0.2, %v466_v44  ;;  %v397_v21 = vmul.f32 %v1328_v16, %v1671_v0 }
  0x66   : > { %1563 = vst [vmem:[%s1718_s26 + $0xb8] sm:$0xff] %v1468_v57   ;;  %vm531_vm3 = vcmp.ge.f32.partialorder %v467_v45, 0.0  ;;  %v595_v22 = vmul.f32 0.2, %v467_v45  ;;  %v398_v23 = vmul.f32 %v1329_v17, %v1671_v0  ;;  %v1332_v24 = vunpack.c.l.bf16 %v1782_v4 }
  0x67   : > { %1564 = vst [vmem:[%s1718_s26 + $0xc0] sm:$0xff] %v1473_v19   ;;  %v658_v53 = vsel %vm530_vm2, %v466_v44, %v594_v20  ;;  %v468_v3 = vadd.f32 %v1680_v9, %v397_v21  ;;  %v1333_v25 = vunpack.c.h.bf16 %v1782_v4  ;;  %v1336_v26 = vunpack.c.l.bf16 %v1785_v5 }
  0x68   : > { %v659_v54 = vsel %vm531_vm3, %v467_v45, %v595_v22  ;;  %v469_v27 = vadd.f32 %v1680_v9, %v398_v23  ;;  %v399_v28 = vmul.f32 %v1332_v24, %v1671_v0  ;;  %v1337_v29 = vunpack.c.h.bf16 %v1785_v5 }
  0x69   : > { %v1478_v32 = vpack.c.bf16 %v659_v54, %v658_v53  ;;  %vm532_vm4 = vcmp.ge.f32.partialorder %v468_v3, 0.0  ;;  %v596_v49 = vmul.f32 0.2, %v468_v3  ;;  %v400_v33 = vmul.f32 %v1333_v25, %v1671_v0 }
  0x6a   : > { %vm533_vm5 = vcmp.ge.f32.partialorder %v469_v27, 0.0  ;;  %v597_v34 = vmul.f32 0.2, %v469_v27  ;;  %v470_v35 = vadd.f32 %v1680_v9, %v399_v28  ;;  %v401_v4 = vmul.f32 %v1336_v26, %v1671_v0 }
  0x6b   : > { %1565 = vst [vmem:[%s1718_s26 + $0xc8] sm:$0xff] %v1478_v32   ;;  %v660_v36 = vsel %vm532_vm4, %v468_v3, %v596_v49  ;;  %v471_v50 = vadd.f32 %v1680_v9, %v400_v33  ;;  %v402_v55 = vmul.f32 %v1337_v29, %v1671_v0  ;;  %v1340_v5 = vunpack.c.l.bf16 %v1791_v10 }
  0x6c   : > { %v661_v30 = vsel %vm533_vm5, %v469_v27, %v597_v34  ;;  %vm534_vm6 = vcmp.ge.f32.partialorder %v470_v35, 0.0  ;;  %v598_v31 = vmul.f32 0.2, %v470_v35  ;;  %v472_v37 = vadd.f32 %v1680_v9, %v401_v4 }
  0x6d   : > { %v1483_v59 = vpack.c.bf16 %v661_v30, %v660_v36  ;;  %vm535_vm7 = vcmp.ge.f32.partialorder %v471_v50, 0.0  ;;  %v599_v46 = vmul.f32 0.2, %v471_v50  ;;  %v473_v38 = vadd.f32 %v1680_v9, %v402_v55 }
  0x6e   : > { %v662_v40 = vsel %vm534_vm6, %v470_v35, %v598_v31  ;;  %vm536_vm8 = vcmp.ge.f32.partialorder %v472_v37, 0.0  ;;  %v600_v51 = vmul.f32 0.2, %v472_v37  ;;  %v1341_v41 = vunpack.c.h.bf16 %v1791_v10 }
  0x6f   : > { %1566 = vst [vmem:[%s1718_s26 + $0xd0] sm:$0xff] %v1483_v59   ;;  %v663_v60 = vsel %vm535_vm7, %v471_v50, %v599_v46  ;;  %vm537_vm9 = vcmp.ge.f32.partialorder %v473_v38, 0.0  ;;  %v601_v42 = vmul.f32 0.2, %v473_v38  ;;  %v403_v43 = vmul.f32 %v1340_v5, %v1671_v0 }
  0x70   : > { %v1488_v39 = vpack.c.bf16 %v663_v60, %v662_v40  ;;  %v664_v61 = vsel %vm536_vm8, %v472_v37, %v600_v51  ;;  %v404_v63 = vmul.f32 %v1341_v41, %v1671_v0  ;;  %v1344_v1 = vunpack.c.l.bf16 %v1794_v11 }
  0x71   : > { %v665_v47 = vsel %vm537_vm9, %v473_v38, %v601_v42  ;;  %v474_v2 = vadd.f32 %v1680_v9, %v403_v43  ;;  %v1345_v62 = vunpack.c.h.bf16 %v1794_v11  ;;  %v1348_v10 = vunpack.c.l.bf16 %v1797_v12 }
  0x72   : > { %1567 = vst [vmem:[%s1718_s26 + $0xd8] sm:$0xff] %v1488_v39   ;;  %v1493_v52 = vpack.c.bf16 %v665_v47, %v664_v61  ;;  %v475_v6 = vadd.f32 %v1680_v9, %v404_v63  ;;  %v405_v7 = vmul.f32 %v1344_v1, %v1671_v0  ;;  %v1349_v8 = vunpack.c.h.bf16 %v1797_v12 }
  0x73   : > { %vm538_vm10 = vcmp.ge.f32.partialorder %v474_v2, 0.0  ;;  %v602_v48 = vmul.f32 0.2, %v474_v2  ;;  %v406_v13 = vmul.f32 %v1345_v62, %v1671_v0  ;;  %v407_v14 = vmul.f32 %v1348_v10, %v1671_v0 }
  0x74   : > { %1568 = vst [vmem:[%s1718_s26 + $0xe0] sm:$0xff] %v1493_v52   ;;  %vm539_vm11 = vcmp.ge.f32.partialorder %v475_v6, 0.0  ;;  %v603_v56 = vmul.f32 0.2, %v475_v6  ;;  %v476_v11 = vadd.f32 %v1680_v9, %v405_v7  ;;  %v408_v15 = vmul.f32 %v1349_v8, %v1671_v0 }
  0x75   : > { %v666_v44 = vsel %vm538_vm10, %v474_v2, %v602_v48  ;;  %v477_v16 = vadd.f32 %v1680_v9, %v406_v13  ;;  %v478_v17 = vadd.f32 %v1680_v9, %v407_v14 }
  0x76   : > { %v667_v12 = vsel %vm539_vm11, %v475_v6, %v603_v56  ;;  %vm540_vm12 = vcmp.ge.f32.partialorder %v476_v11, 0.0  ;;  %v604_v57 = vmul.f32 0.2, %v476_v11  ;;  %v479_v18 = vadd.f32 %v1680_v9, %v408_v15 }
  0x77   : > { %v1498_v58 = vpack.c.bf16 %v667_v12, %v666_v44  ;;  %vm541_vm13 = vcmp.ge.f32.partialorder %v477_v16, 0.0  ;;  %v605_v45 = vmul.f32 0.2, %v477_v16  ;;  %vm542_vm14 = vcmp.ge.f32.partialorder %v478_v17, 0.0 }
  0x78   : > { %v668_v19 = vsel %vm540_vm12, %v476_v11, %v604_v57  ;;  %vm543_vm15 = vcmp.ge.f32.partialorder %v479_v18, 0.0  ;;  %v606_v0 = vmul.f32 0.2, %v478_v17  ;;  %v607_v20 = vmul.f32 0.2, %v479_v18 }
  0x79   : > { %1569 = vst [vmem:[%s1718_s26 + $0xe8] sm:$0xff] %v1498_v58   ;;  %v669_v21 = vsel %vm541_vm13, %v477_v16, %v605_v45 }
  0x7a   : > { %v1503_v22 = vpack.c.bf16 %v669_v21, %v668_v19  ;;  %v670_v23 = vsel %vm542_vm14, %v478_v17, %v606_v0  ;;  %v671_v24 = vsel %vm543_vm15, %v479_v18, %v607_v20 }
  0x7b   : > { %v1508_v53 = vpack.c.bf16 %v671_v24, %v670_v23 }
  0x7c   : > { %1570 = vst [vmem:[%s1718_s26 + $0xf0] sm:$0xff] %v1503_v22  }
  0x7d   : > { %1571 = vst [vmem:[%s1718_s26 + $0xf8] sm:$0xff] %v1508_v53  }
  0x7e PF: > { %s13_s14 = sadd.s32 1, %s1618_s14   ;;  %s2014_s12 = smov %s1614_s13 }
  0x7f   : > { %p10_p5 = scmp.ge.s32.totalorder %s13_s14, 6   ;;  %s2015_s13 = smov %s2017_s15 }
  0x81   :  { %12 = sbr.rel (!%p10_p5) target bundleno = 2 (0x2), region = 62 }

</bundles_post_ra>
